<compile_context>
chip_gen: v6e
topology: v6e:2x2x1
jax: 0.10.0
libtpu: 0.0.40
codegen_flags: <defaults>
</compile_context>

<pallas_src>
import functools
import math

import jax
import jax.numpy as jnp
from jax.experimental import pallas as pl
from jax.experimental.pallas import tpu as pltpu


def _round_up(n, m):
    return ((n + m - 1) // m) * m


# ---------------------------------------------------------------------------
# Pallas kernel 1: fused PReLU + normalization over the sublane ("E") axis.
#   x: [G1, G2, E, N] (normalize each lane-column over E)
#   alpha: [G2, 1, 1] PReLU slope (1.0 => identity), gamma/beta: [G2, E, 1]
# ---------------------------------------------------------------------------
def _prelu_norm_kernel(alpha_ref, gamma_ref, beta_ref, x_ref, o_ref, *, eps):
    x = x_ref[0, 0].astype(jnp.float32)            # (E, TILE_N)
    a = alpha_ref[0]                                # (1, 1)
    z = jnp.where(x >= 0, x, a * x)                 # PReLU
    mu = jnp.mean(z, axis=0, keepdims=True)         # (1, TILE_N)
    var = jnp.mean(jnp.square(z - mu), axis=0, keepdims=True)
    inv = jax.lax.rsqrt(var + eps)
    g = gamma_ref[0]                                # (E, 1)
    b = beta_ref[0]                                 # (E, 1)
    o_ref[0, 0] = ((z - mu) * inv * g + b).astype(o_ref.dtype)


def prelu_norm(x, alpha, gamma, beta, eps, use_pallas=True, tile_n=512):
    """x: [G1, G2, E, N]; alpha: [G2]; gamma/beta: [G2, E]."""
    G1, G2, E, N = x.shape
    xf = x.astype(jnp.float32)
    a = alpha.reshape(G2, 1, 1).astype(jnp.float32)
    g = gamma.reshape(G2, E, 1).astype(jnp.float32)
    b = beta.reshape(G2, E, 1).astype(jnp.float32)

    if not use_pallas:                              # pure-JAX reference path
        z = jnp.where(xf >= 0, xf, a[None] * xf)
        mu = jnp.mean(z, axis=2, keepdims=True)
        var = jnp.mean(jnp.square(z - mu), axis=2, keepdims=True)
        return ((z - mu) * jax.lax.rsqrt(var + eps) * g[None] + b[None]).astype(x.dtype)

    tn = min(tile_n, _round_up(N, 128))             # lane-dense tile, multiple of 128
    Np = _round_up(N, tn)
    if Np != N:
        xf = jnp.pad(xf, ((0, 0), (0, 0), (0, 0), (0, Np - N)))

    out = pl.pallas_call(
        functools.partial(_prelu_norm_kernel, eps=eps),
        out_shape=jax.ShapeDtypeStruct((G1, G2, E, Np), jnp.float32),
        grid_spec=pltpu.PrefetchScalarGridSpec(
            num_scalar_prefetch=0,
            grid=(G1, G2, Np // tn),
            in_specs=[
                pl.BlockSpec((1, 1, 1), lambda i, j, n: (j, 0, 0)),       # alpha
                pl.BlockSpec((1, E, 1), lambda i, j, n: (j, 0, 0)),       # gamma
                pl.BlockSpec((1, E, 1), lambda i, j, n: (j, 0, 0)),       # beta
                pl.BlockSpec((1, 1, E, tn), lambda i, j, n: (i, j, 0, n)),  # x
            ],
            out_specs=pl.BlockSpec((1, 1, E, tn), lambda i, j, n: (i, j, 0, n)),
        ),
        compiler_params=pltpu.CompilerParams(
            dimension_semantics=("parallel", "parallel", "parallel"),
        ),
    )(a, g, b, xf)
    return out[..., :N].astype(x.dtype)


def layer_norm_lastdim(x, weight, bias, eps, use_pallas=True):
    """nn.LayerNorm over the last dim; channels -> sublanes, positions -> lanes."""
    shp = x.shape
    C = shp[-1]
    xt = jnp.transpose(x.reshape(-1, C))            # [C, Ntot]
    y = prelu_norm(xt[None, None], jnp.ones((1,), jnp.float32),
                   weight.reshape(1, C), bias.reshape(1, C), eps, use_pallas)
    return jnp.transpose(y[0, 0]).reshape(shp)


def head_prelu_norm(y, n_head, alpha, gamma, beta, eps, use_pallas=True):
    """AllHeadPReLULayerNormalization4DC: [B, H*E, T, F] -> [B, H, E, T, F]."""
    B, HE, T, F = y.shape
    E = HE // n_head
    x4 = y.reshape(B, n_head, E, T * F)
    out = prelu_norm(x4, alpha, gamma, beta, eps, use_pallas)
    return out.reshape(B, n_head, E, T, F)


def channel_prelu_norm(y, alpha, gamma, beta, eps, use_pallas=True):
    """PReLU + LayerNormalization(dim=-3) of attn_concat_proj on [B, C, T, F]."""
    B, C, T, F = y.shape
    x4 = y.reshape(B, 1, C, T * F)
    out = prelu_norm(x4, alpha.reshape(1), gamma.reshape(1, C),
                     beta.reshape(1, C), eps, use_pallas)
    return out.reshape(B, C, T, F)


# ---------------------------------------------------------------------------
# Pallas kernel 2: fused causal attention, one (batch*head) per grid step.
# ---------------------------------------------------------------------------
_MASK_VALUE = -1e30


def _causal_attn_kernel(q_ref, k_ref, v_ref, o_ref, *, scale):
    q = q_ref[0].astype(jnp.float32)                # (T, Dq)
    k = k_ref[0].astype(jnp.float32)                # (Dq, T)
    v = v_ref[0].astype(jnp.float32)                # (T, Dv)
    s = jnp.dot(q, k, preferred_element_type=jnp.float32) * scale
    T = s.shape[0]
    row = jax.lax.broadcasted_iota(jnp.int32, (T, T), 0)
    col = jax.lax.broadcasted_iota(jnp.int32, (T, T), 1)
    s = jnp.where(col <= row, s, _MASK_VALUE)
    m = jnp.max(s, axis=-1, keepdims=True)
    p = jnp.exp(s - m)
    p = p / jnp.sum(p, axis=-1, keepdims=True)
    o_ref[0] = jnp.dot(p, v, preferred_element_type=jnp.float32).astype(o_ref.dtype)


def causal_attention(q, k, v, scale, use_pallas=True):
    """q: [G, T, Dq], k: [G, Dq, T], v: [G, T, Dv] -> [G, T, Dv] (f32)."""
    G, T, Dq = q.shape
    Dv = v.shape[-1]
    if not use_pallas:
        s = jnp.einsum('gtd,gds->gts', q, k).astype(jnp.float32) * scale
        mask = jnp.tril(jnp.ones((T, T), dtype=bool))
        s = jnp.where(mask[None], s, _MASK_VALUE)
        p = jax.nn.softmax(s, axis=-1)
        return jnp.einsum('gts,gsd->gtd', p, v.astype(jnp.float32))

    return pl.pallas_call(
        functools.partial(_causal_attn_kernel, scale=scale),
        out_shape=jax.ShapeDtypeStruct((G, T, Dv), jnp.float32),
        grid_spec=pltpu.PrefetchScalarGridSpec(
            num_scalar_prefetch=0,
            grid=(G,),
            in_specs=[
                pl.BlockSpec((1, T, Dq), lambda g: (g, 0, 0)),
                pl.BlockSpec((1, Dq, T), lambda g: (g, 0, 0)),
                pl.BlockSpec((1, T, Dv), lambda g: (g, 0, 0)),
            ],
            out_specs=pl.BlockSpec((1, T, Dv), lambda g: (g, 0, 0)),
        ),
        compiler_params=pltpu.CompilerParams(
            dimension_semantics=("parallel",),
        ),
    )(q, k, v)


# ---------------------------------------------------------------------------
# XLA-side helpers (LSTM recurrence, unfold, transposed conv, 1x1 conv).
# ---------------------------------------------------------------------------
def _lstm_scan(x_proj, w_hh):
    N, L, G4 = x_proj.shape
    H = G4 // 4

    def step(carry, xt):
        h, c = carry
        gates = xt + h @ w_hh.T
        i, f, g, o = jnp.split(gates, 4, axis=-1)
        i = jax.nn.sigmoid(i)
        f = jax.nn.sigmoid(f)
        g = jnp.tanh(g)
        o = jax.nn.sigmoid(o)
        c = f * c + i * g
        h = o * jnp.tanh(c)
        return (h, c), h

    h0 = jnp.zeros((N, H), x_proj.dtype)
    _, hs = jax.lax.scan(step, (h0, h0), jnp.swapaxes(x_proj, 0, 1))
    return jnp.swapaxes(hs, 0, 1)                   # [N, L, H]


def lstm_forward(x, w_ih, w_hh, b_ih, b_hh, reverse=False):
    # TODO(synk): sequential recurrence kept in lax.scan; input matmul hoisted to XLA.
    xp = jnp.einsum('nld,gd->nlg', x, w_ih) + b_ih + b_hh
    if reverse:
        xp = xp[:, ::-1]
    hs = _lstm_scan(xp, w_hh)
    return hs[:, ::-1] if reverse else hs


def bilstm(x, prm):
    fwd = lstm_forward(x, prm['w_ih'], prm['w_hh'], prm['b_ih'], prm['b_hh'])
    bwd = lstm_forward(x, prm['w_ih_r'], prm['w_hh_r'], prm['b_ih_r'], prm['b_hh_r'],
                       reverse=True)
    return jnp.concatenate([fwd, bwd], axis=-1)


def unfold1d(x, ks, hs):
    """F.unfold(x[..., None], (ks, 1), stride=(hs, 1)) for x: [N, C, Q]."""
    N, C, Qd = x.shape
    L = (Qd - ks) // hs + 1
    idx = (jnp.arange(L) * hs)[:, None] + jnp.arange(ks)[None, :]     # [L, ks]
    patches = x[:, :, idx]                                             # [N, C, L, ks]
    patches = jnp.transpose(patches, (0, 1, 3, 2))                     # [N, C, ks, L]
    return patches.reshape(N, C * ks, L)


def conv_transpose1d(x, w, b, stride):
    """nn.ConvTranspose1d (padding=0).  x: [N, Cin, L], w: [Cin, Cout, K]."""
    N, Cin, L = x.shape
    _, Cout, K = w.shape
    Lout = (L - 1) * stride + K
    y = jnp.einsum('ncl,cok->nokl', x, w)                              # [N, Cout, K, L]
    out = jnp.zeros((N, Cout, Lout), x.dtype)
    for k in range(K):
        out = out.at[:, :, k:k + (L - 1) * stride + 1:stride].add(y[:, :, k, :])
    return out + b[None, :, None]


def conv1x1(x, w, b):
    """nn.Conv2d(Cin, Cout, 1).  x: [B, Cin, T, F], w: [Cout, Cin]."""
    return jnp.einsum('bchw,oc->bohw', x, w) + b[None, :, None, None]


# ---------------------------------------------------------------------------
# GridNetV3Block forward.
# ---------------------------------------------------------------------------
def gridnetv3_block_forward(x, p, *, emb_ks, emb_hs, n_head, eps=1e-5,
                            use_pallas=True):
    assert emb_ks != emb_hs  # TODO(synk): emb_ks == emb_hs branch not implemented
    B, C, old_T, old_Q = x.shape
    olp = emb_ks - emb_hs
    T = math.ceil((old_T + 2 * olp - emb_ks) / emb_hs) * emb_hs + emb_ks
    Qd = math.ceil((old_Q + 2 * olp - emb_ks) / emb_hs) * emb_hs + emb_ks

    x = jnp.transpose(x, (0, 2, 3, 1))                     # [B, T0, Q0, C]
    x = jnp.pad(x, ((0, 0), (olp, T - old_T - olp),
                    (olp, Qd - old_Q - olp), (0, 0)))      # [B, T, Qd, C]
    input_ = x

    # ---------------- intra (along Q, bidirectional) ----------------
    h = layer_norm_lastdim(input_, p['intra_norm_w'], p['intra_norm_b'], eps, use_pallas)
    h = h.reshape(B * T, Qd, C)
    h = jnp.swapaxes(h, 1, 2)                              # [B*T, C, Qd]
    h = unfold1d(h, emb_ks, emb_hs)                        # [B*T, C*ks, Lq]
    h = jnp.swapaxes(h, 1, 2)                              # [B*T, Lq, C*ks]
    h = bilstm(h, p['intra_rnn'])                          # [B*T, Lq, 2*hid]
    h = jnp.swapaxes(h, 1, 2)
    h = conv_transpose1d(h, p['intra_linear_w'], p['intra_linear_b'], emb_hs)
    h = h.reshape(B, T, C, Qd)
    h = jnp.swapaxes(h, -2, -1)                            # [B, T, Qd, C]
    intra = h + input_
    intra = jnp.swapaxes(intra, 1, 2)                      # [B, Qd, T, C]
    input_ = intra

    # ---------------- inter (along T, unidirectional) ----------------
    h = layer_norm_lastdim(input_, p['inter_norm_w'], p['inter_norm_b'], eps, use_pallas)
    h = h.reshape(B * Qd, T, C)
    h = jnp.swapaxes(h, 1, 2)                              # [B*Qd, C, T]
    h = unfold1d(h, emb_ks, emb_hs)                        # [B*Qd, C*ks, Lt]
    h = jnp.swapaxes(h, 1, 2)
    r = p['inter_rnn']
    h = lstm_forward(h, r['w_ih'], r['w_hh'], r['b_ih'], r['b_hh'])
    h = jnp.swapaxes(h, 1, 2)
    h = conv_transpose1d(h, p['inter_linear_w'], p['inter_linear_b'], emb_hs)
    h = h.reshape(B, Qd, C, T)
    h = jnp.swapaxes(h, -2, -1)                            # [B, Qd, T, C]
    inter = h + input_
    inter = jnp.transpose(inter, (0, 3, 2, 1))             # [B, C, T, Qd]
    inter = inter[:, :, olp:olp + old_T, olp:olp + old_Q]  # [B, C, T0, Q0]

    # ---------------- causal self-attention ----------------
    H = n_head
    E = p['q_gamma'].shape[1]
    Ev = C // H
    Fd = old_Q

    q = head_prelu_norm(conv1x1(inter, p['q_w'], p['q_b']), H,
                        p['q_alpha'], p['q_gamma'], p['q_beta'], eps, use_pallas)
    k = head_prelu_norm(conv1x1(inter, p['k_w'], p['k_b']), H,
                        p['k_alpha'], p['k_gamma'], p['k_beta'], eps, use_pallas)
    v = head_prelu_norm(conv1x1(inter, p['v_w'], p['v_b']), H,
                        p['v_alpha'], p['v_gamma'], p['v_beta'], eps, use_pallas)

    q = q.reshape(B * H, E, old_T, Fd)
    k = k.reshape(B * H, E, old_T, Fd)
    v = v.reshape(B * H, Ev, old_T, Fd)

    qm = jnp.swapaxes(q, 1, 2).reshape(B * H, old_T, E * Fd)
    km = jnp.swapaxes(k, 2, 3).reshape(B * H, E * Fd, old_T)
    vm = jnp.swapaxes(v, 1, 2).reshape(B * H, old_T, Ev * Fd)

    scale = 1.0 / math.sqrt(E * Fd)
    av = causal_attention(qm, km, vm, scale, use_pallas)   # [B*H, T0, Ev*F]
    av = av.reshape(B * H, old_T, Ev, Fd)
    av = jnp.swapaxes(av, 1, 2)                            # [B*H, Ev, T0, F]
    batch = av.reshape(B, H * Ev, old_T, Fd)               # [B, C, T0, Q0]

    batch = conv1x1(batch, p['proj_w'], p['proj_b'])
    batch = channel_prelu_norm(batch, p['proj_alpha'], p['proj_gamma'],
                               p['proj_beta'], eps, use_pallas)
    return batch + inter


# ---------------------------------------------------------------------------
# Deterministic synthetic parameters.
# ---------------------------------------------------------------------------
def init_params(key, C, emb_ks, hidden, n_head, E):
    in_ch = C * emb_ks
    Ev = C // n_head
    keys = iter(jax.random.split(key, 40))

    def nrm(shape, s=0.2):
        return s * jax.random.normal(next(keys), shape, jnp.float32)

    return {
        'intra_norm_w': 1.0 + nrm((C,), 0.1), 'intra_norm_b': nrm((C,), 0.1),
        'intra_rnn': dict(
            w_ih=nrm((4 * hidden, in_ch)), w_hh=nrm((4 * hidden, hidden)),
            b_ih=nrm((4 * hidden,), 0.1), b_hh=nrm((4 * hidden,), 0.1),
            w_ih_r=nrm((4 * hidden, in_ch)), w_hh_r=nrm((4 * hidden, hidden)),
            b_ih_r=nrm((4 * hidden,), 0.1), b_hh_r=nrm((4 * hidden,), 0.1)),
        'intra_linear_w': nrm((2 * hidden, C, emb_ks)), 'intra_linear_b': nrm((C,), 0.1),
        'inter_norm_w': 1.0 + nrm((C,), 0.1), 'inter_norm_b': nrm((C,), 0.1),
        'inter_rnn': dict(
            w_ih=nrm((4 * hidden, in_ch)), w_hh=nrm((4 * hidden, hidden)),
            b_ih=nrm((4 * hidden,), 0.1), b_hh=nrm((4 * hidden,), 0.1)),
        'inter_linear_w': nrm((hidden, C, emb_ks)), 'inter_linear_b': nrm((C,), 0.1),
        'q_w': nrm((n_head * E, C)), 'q_b': nrm((n_head * E,), 0.1),
        'q_alpha': 0.25 * jnp.ones((n_head,), jnp.float32),
        'q_gamma': 1.0 + nrm((n_head, E), 0.1), 'q_beta': nrm((n_head, E), 0.1),
        'k_w': nrm((n_head * E, C)), 'k_b': nrm((n_head * E,), 0.1),
        'k_alpha': 0.25 * jnp.ones((n_head,), jnp.float32),
        'k_gamma': 1.0 + nrm((n_head, E), 0.1), 'k_beta': nrm((n_head, E), 0.1),
        'v_w': nrm((n_head * Ev, C)), 'v_b': nrm((n_head * Ev,), 0.1),
        'v_alpha': 0.25 * jnp.ones((n_head,), jnp.float32),
        'v_gamma': 1.0 + nrm((n_head, Ev), 0.1), 'v_beta': nrm((n_head, Ev), 0.1),
        'proj_w': nrm((C, C)), 'proj_b': nrm((C,), 0.1),
        'proj_alpha': 0.25 * jnp.ones((1,), jnp.float32),
        'proj_gamma': 1.0 + nrm((C,), 0.1), 'proj_beta': nrm((C,), 0.1),
    }


if __name__ == "__main__":
    B, C, old_T, old_Q = 2, 8, 16, 16
    emb_ks, emb_hs, hidden, n_head, E = 4, 1, 16, 4, 4

    key = jax.random.PRNGKey(0)
    pkey, xkey = jax.random.split(key)
    params = init_params(pkey, C, emb_ks, hidden, n_head, E)
    x = jax.random.normal(xkey, (B, C, old_T, old_Q), jnp.float32)

    fwd = jax.jit(functools.partial(gridnetv3_block_forward, emb_ks=emb_ks,
                                    emb_hs=emb_hs, n_head=n_head, eps=1e-5,
                                    use_pallas=True))
    ref_fwd = jax.jit(functools.partial(gridnetv3_block_forward, emb_ks=emb_ks,
                                        emb_hs=emb_hs, n_head=n_head, eps=1e-5,
                                        use_pallas=False))

    out = jax.block_until_ready(fwd(x, params))
    ref = jax.block_until_ready(ref_fwd(x, params))

    assert out.shape == (B, C, old_T, old_Q), out.shape
    max_err = float(jnp.max(jnp.abs(out - ref)))
    assert max_err < 2e-3, f"mismatch vs pure-JAX reference: max_err={max_err}"
    print("KERNEL_OK")
</pallas_src>

<mosaic_0001>
module attributes {stable_mosaic.version = 11 : i64} {
  func.func @_prelu_norm_kernel(%arg0: i32, %arg1: i32, %arg2: i32, %arg3: memref<1x1x1xf32, #tpu.memory_space<vmem>>, %arg4: memref<1x8x1xf32, #tpu.memory_space<vmem>>, %arg5: memref<1x8x1xf32, #tpu.memory_space<vmem>>, %arg6: memref<1x1x8x512xf32, #tpu.memory_space<vmem>>, %arg7: memref<1x1x8x512xf32, #tpu.memory_space<vmem>>) attributes {dimension_semantics = [#tpu.dimension_semantics<parallel>, #tpu.dimension_semantics<parallel>, #tpu.dimension_semantics<parallel>], iteration_bounds = array<i64: 1, 1, 2>, scalar_prefetch = 0 : i64, scratch_operands = 0 : i64, tpu.core_type = #tpu.core_type<tc>, window_params = [{transform_indices = @transform_0, window_bounds = array<i64: 1, 1, 1>}, {transform_indices = @transform_1, window_bounds = array<i64: 1, 8, 1>}, {transform_indices = @transform_2, window_bounds = array<i64: 1, 8, 1>}, {transform_indices = @transform_3, window_bounds = array<i64: 1, 1, 8, 512>}, {transform_indices = @transform_4, window_bounds = array<i64: 1, 1, 8, 512>}]} {
    %c0 = arith.constant 0 : index
    %c0_0 = arith.constant 0 : index
    %c0_1 = arith.constant 0 : index
    %c0_2 = arith.constant 0 : index
    %0 = vector.load %arg6[%c0, %c0_0, %c0_1, %c0_2] : memref<1x1x8x512xf32, #tpu.memory_space<vmem>>, vector<1x1x8x512xf32>
    %1 = vector.shape_cast %0 : vector<1x1x8x512xf32> to vector<8x512xf32>
    %c0_3 = arith.constant 0 : index
    %c0_4 = arith.constant 0 : index
    %c0_5 = arith.constant 0 : index
    %2 = vector.load %arg3[%c0_3, %c0_4, %c0_5] : memref<1x1x1xf32, #tpu.memory_space<vmem>>, vector<1x1x1xf32>
    %3 = vector.shape_cast %2 : vector<1x1x1xf32> to vector<1x1xf32>
    %cst = arith.constant 0.000000e+00 : f32
    %4 = vector.broadcast %cst : f32 to vector<8x512xf32>
    %5 = arith.cmpf oge, %1, %4 : vector<8x512xf32>
    %6 = vector.broadcast %3 : vector<1x1xf32> to vector<8x512xf32>
    %7 = arith.mulf %6, %1 : vector<8x512xf32>
    %8 = arith.select %5, %1, %7 : vector<8x512xi1>, vector<8x512xf32>
    %cst_6 = arith.constant dense<0.000000e+00> : vector<512xf32>
    %9 = vector.multi_reduction <add>, %8, %cst_6 [0] : vector<8x512xf32> to vector<512xf32>
    %10 = vector.shape_cast %9 : vector<512xf32> to vector<1x512xf32>
    %cst_7 = arith.constant 8.000000e+00 : f32
    %11 = vector.broadcast %cst_7 : f32 to vector<1x512xf32>
    %12 = arith.divf %10, %11 : vector<1x512xf32>
    %13 = vector.broadcast %12 : vector<1x512xf32> to vector<8x512xf32>
    %14 = arith.subf %8, %13 : vector<8x512xf32>
    %15 = arith.mulf %14, %14 : vector<8x512xf32>
    %cst_8 = arith.constant dense<0.000000e+00> : vector<512xf32>
    %16 = vector.multi_reduction <add>, %15, %cst_8 [0] : vector<8x512xf32> to vector<512xf32>
    %17 = vector.shape_cast %16 : vector<512xf32> to vector<1x512xf32>
    %cst_9 = arith.constant 8.000000e+00 : f32
    %18 = vector.broadcast %cst_9 : f32 to vector<1x512xf32>
    %19 = arith.divf %17, %18 : vector<1x512xf32>
    %cst_10 = arith.constant 9.99999974E-6 : f32
    %20 = vector.broadcast %cst_10 : f32 to vector<1x512xf32>
    %21 = arith.addf %19, %20 : vector<1x512xf32>
    %22 = math.rsqrt %21 : vector<1x512xf32>
    %c0_11 = arith.constant 0 : index
    %c0_12 = arith.constant 0 : index
    %c0_13 = arith.constant 0 : index
    %23 = vector.load %arg4[%c0_11, %c0_12, %c0_13] : memref<1x8x1xf32, #tpu.memory_space<vmem>>, vector<1x8x1xf32>
    %24 = vector.shape_cast %23 : vector<1x8x1xf32> to vector<8x1xf32>
    %c0_14 = arith.constant 0 : index
    %c0_15 = arith.constant 0 : index
    %c0_16 = arith.constant 0 : index
    %25 = vector.load %arg5[%c0_14, %c0_15, %c0_16] : memref<1x8x1xf32, #tpu.memory_space<vmem>>, vector<1x8x1xf32>
    %26 = vector.shape_cast %25 : vector<1x8x1xf32> to vector<8x1xf32>
    %27 = vector.broadcast %12 : vector<1x512xf32> to vector<8x512xf32>
    %28 = arith.subf %8, %27 : vector<8x512xf32>
    %29 = vector.broadcast %22 : vector<1x512xf32> to vector<8x512xf32>
    %30 = arith.mulf %28, %29 : vector<8x512xf32>
    %31 = vector.broadcast %24 : vector<8x1xf32> to vector<8x512xf32>
    %32 = arith.mulf %30, %31 : vector<8x512xf32>
    %33 = vector.broadcast %26 : vector<8x1xf32> to vector<8x512xf32>
    %34 = arith.addf %32, %33 : vector<8x512xf32>
    %c0_17 = arith.constant 0 : index
    %c0_18 = arith.constant 0 : index
    %c0_19 = arith.constant 0 : index
    %c0_20 = arith.constant 0 : index
    %35 = vector.load %arg7[%c0_17, %c0_18, %c0_19, %c0_20] : memref<1x1x8x512xf32, #tpu.memory_space<vmem>>, vector<1x1x8x512xf32>
    %36 = vector.shape_cast %35 : vector<1x1x8x512xf32> to vector<8x512xf32>
    %37 = vector.shape_cast %34 : vector<8x512xf32> to vector<1x1x8x512xf32>
    tpu.vector_store %arg7[%c0_17, %c0_18, %c0_19, %c0_20], %37 {strides = array<i32>} : memref<1x1x8x512xf32, #tpu.memory_space<vmem>>, vector<1x1x8x512xf32>,
    return
  }
  func.func @transform_0(%arg0: i32, %arg1: i32, %arg2: i32) -> (i32, i32, i32) {
    %c0_i32 = arith.constant 0 : i32
    %c0_i32_0 = arith.constant 0 : i32
    %c0_i32_1 = arith.constant 0 : i32
    return %arg1, %c0_i32, %c0_i32_0 : i32, i32, i32
  }
  func.func @transform_1(%arg0: i32, %arg1: i32, %arg2: i32) -> (i32, i32, i32) {
    %c0_i32 = arith.constant 0 : i32
    %c0_i32_0 = arith.constant 0 : i32
    %c0_i32_1 = arith.constant 0 : i32
    return %arg1, %c0_i32, %c0_i32_0 : i32, i32, i32
  }
  func.func @transform_2(%arg0: i32, %arg1: i32, %arg2: i32) -> (i32, i32, i32) {
    %c0_i32 = arith.constant 0 : i32
    %c0_i32_0 = arith.constant 0 : i32
    %c0_i32_1 = arith.constant 0 : i32
    return %arg1, %c0_i32, %c0_i32_0 : i32, i32, i32
  }
  func.func @transform_3(%arg0: i32, %arg1: i32, %arg2: i32) -> (i32, i32, i32, i32) {
    %c0_i32 = arith.constant 0 : i32
    %c0_i32_0 = arith.constant 0 : i32
    return %arg0, %arg1, %c0_i32, %arg2 : i32, i32, i32, i32
  }
  func.func @transform_4(%arg0: i32, %arg1: i32, %arg2: i32) -> (i32, i32, i32, i32) {
    %c0_i32 = arith.constant 0 : i32
    %c0_i32_0 = arith.constant 0 : i32
    return %arg0, %arg1, %c0_i32, %arg2 : i32, i32, i32, i32
  }
}

module attributes {stable_mosaic.version = 11 : i64} {
  func.func @_prelu_norm_kernel(%arg0: i32, %arg1: i32, %arg2: i32, %arg3: memref<1x1x1xf32, #tpu.memory_space<vmem>>, %arg4: memref<1x4x1xf32, #tpu.memory_space<vmem>>, %arg5: memref<1x4x1xf32, #tpu.memory_space<vmem>>, %arg6: memref<1x1x4x256xf32, #tpu.memory_space<vmem>>, %arg7: memref<1x1x4x256xf32, #tpu.memory_space<vmem>>) attributes {dimension_semantics = [#tpu.dimension_semantics<parallel>, #tpu.dimension_semantics<parallel>, #tpu.dimension_semantics<parallel>], iteration_bounds = array<i64: 2, 4, 1>, scalar_prefetch = 0 : i64, scratch_operands = 0 : i64, tpu.core_type = #tpu.core_type<tc>, window_params = [{transform_indices = @transform_0, window_bounds = array<i64: 1, 1, 1>}, {transform_indices = @transform_1, window_bounds = array<i64: 1, 4, 1>}, {transform_indices = @transform_2, window_bounds = array<i64: 1, 4, 1>}, {transform_indices = @transform_3, window_bounds = array<i64: 1, 1, 4, 256>}, {transform_indices = @transform_4, window_bounds = array<i64: 1, 1, 4, 256>}]} {
    %c0 = arith.constant 0 : index
    %c0_0 = arith.constant 0 : index
    %c0_1 = arith.constant 0 : index
    %c0_2 = arith.constant 0 : index
    %0 = vector.load %arg6[%c0, %c0_0, %c0_1, %c0_2] : memref<1x1x4x256xf32, #tpu.memory_space<vmem>>, vector<1x1x4x256xf32>
    %1 = vector.shape_cast %0 : vector<1x1x4x256xf32> to vector<4x256xf32>
    %c0_3 = arith.constant 0 : index
    %c0_4 = arith.constant 0 : index
    %c0_5 = arith.constant 0 : index
    %2 = vector.load %arg3[%c0_3, %c0_4, %c0_5] : memref<1x1x1xf32, #tpu.memory_space<vmem>>, vector<1x1x1xf32>
    %3 = vector.shape_cast %2 : vector<1x1x1xf32> to vector<1x1xf32>
    %cst = arith.constant 0.000000e+00 : f32
    %4 = vector.broadcast %cst : f32 to vector<4x256xf32>
    %5 = arith.cmpf oge, %1, %4 : vector<4x256xf32>
    %6 = vector.broadcast %3 : vector<1x1xf32> to vector<4x256xf32>
    %7 = arith.mulf %6, %1 : vector<4x256xf32>
    %8 = arith.select %5, %1, %7 : vector<4x256xi1>, vector<4x256xf32>
    %cst_6 = arith.constant dense<0.000000e+00> : vector<256xf32>
    %9 = vector.multi_reduction <add>, %8, %cst_6 [0] : vector<4x256xf32> to vector<256xf32>
    %10 = vector.shape_cast %9 : vector<256xf32> to vector<1x256xf32>
    %cst_7 = arith.constant 4.000000e+00 : f32
    %11 = vector.broadcast %cst_7 : f32 to vector<1x256xf32>
    %12 = arith.divf %10, %11 : vector<1x256xf32>
    %13 = vector.broadcast %12 : vector<1x256xf32> to vector<4x256xf32>
    %14 = arith.subf %8, %13 : vector<4x256xf32>
    %15 = arith.mulf %14, %14 : vector<4x256xf32>
    %cst_8 = arith.constant dense<0.000000e+00> : vector<256xf32>
    %16 = vector.multi_reduction <add>, %15, %cst_8 [0] : vector<4x256xf32> to vector<256xf32>
    %17 = vector.shape_cast %16 : vector<256xf32> to vector<1x256xf32>
    %cst_9 = arith.constant 4.000000e+00 : f32
    %18 = vector.broadcast %cst_9 : f32 to vector<1x256xf32>
    %19 = arith.divf %17, %18 : vector<1x256xf32>
    %cst_10 = arith.constant 9.99999974E-6 : f32
    %20 = vector.broadcast %cst_10 : f32 to vector<1x256xf32>
    %21 = arith.addf %19, %20 : vector<1x256xf32>
    %22 = math.rsqrt %21 : vector<1x256xf32>
    %c0_11 = arith.constant 0 : index
    %c0_12 = arith.constant 0 : index
    %c0_13 = arith.constant 0 : index
    %23 = vector.load %arg4[%c0_11, %c0_12, %c0_13] : memref<1x4x1xf32, #tpu.memory_space<vmem>>, vector<1x4x1xf32>
    %24 = vector.shape_cast %23 : vector<1x4x1xf32> to vector<4x1xf32>
    %c0_14 = arith.constant 0 : index
    %c0_15 = arith.constant 0 : index
    %c0_16 = arith.constant 0 : index
    %25 = vector.load %arg5[%c0_14, %c0_15, %c0_16] : memref<1x4x1xf32, #tpu.memory_space<vmem>>, vector<1x4x1xf32>
    %26 = vector.shape_cast %25 : vector<1x4x1xf32> to vector<4x1xf32>
    %27 = vector.broadcast %12 : vector<1x256xf32> to vector<4x256xf32>
    %28 = arith.subf %8, %27 : vector<4x256xf32>
    %29 = vector.broadcast %22 : vector<1x256xf32> to vector<4x256xf32>
    %30 = arith.mulf %28, %29 : vector<4x256xf32>
    %31 = vector.broadcast %24 : vector<4x1xf32> to vector<4x256xf32>
    %32 = arith.mulf %30, %31 : vector<4x256xf32>
    %33 = vector.broadcast %26 : vector<4x1xf32> to vector<4x256xf32>
    %34 = arith.addf %32, %33 : vector<4x256xf32>
    %c0_17 = arith.constant 0 : index
    %c0_18 = arith.constant 0 : index
    %c0_19 = arith.constant 0 : index
    %c0_20 = arith.constant 0 : index
    %35 = vector.load %arg7[%c0_17, %c0_18, %c0_19, %c0_20] : memref<1x1x4x256xf32, #tpu.memory_space<vmem>>, vector<1x1x4x256xf32>
    %36 = vector.shape_cast %35 : vector<1x1x4x256xf32> to vector<4x256xf32>
    %37 = vector.shape_cast %34 : vector<4x256xf32> to vector<1x1x4x256xf32>
    tpu.vector_store %arg7[%c0_17, %c0_18, %c0_19, %c0_20], %37 {strides = array<i32>} : memref<1x1x4x256xf32, #tpu.memory_space<vmem>>, vector<1x1x4x256xf32>,
    return
  }
  func.func @transform_0(%arg0: i32, %arg1: i32, %arg2: i32) -> (i32, i32, i32) {
    %c0_i32 = arith.constant 0 : i32
    %c0_i32_0 = arith.constant 0 : i32
    %c0_i32_1 = arith.constant 0 : i32
    return %arg1, %c0_i32, %c0_i32_0 : i32, i32, i32
  }
  func.func @transform_1(%arg0: i32, %arg1: i32, %arg2: i32) -> (i32, i32, i32) {
    %c0_i32 = arith.constant 0 : i32
    %c0_i32_0 = arith.constant 0 : i32
    %c0_i32_1 = arith.constant 0 : i32
    return %arg1, %c0_i32, %c0_i32_0 : i32, i32, i32
  }
  func.func @transform_2(%arg0: i32, %arg1: i32, %arg2: i32) -> (i32, i32, i32) {
    %c0_i32 = arith.constant 0 : i32
    %c0_i32_0 = arith.constant 0 : i32
    %c0_i32_1 = arith.constant 0 : i32
    return %arg1, %c0_i32, %c0_i32_0 : i32, i32, i32
  }
  func.func @transform_3(%arg0: i32, %arg1: i32, %arg2: i32) -> (i32, i32, i32, i32) {
    %c0_i32 = arith.constant 0 : i32
    %c0_i32_0 = arith.constant 0 : i32
    return %arg0, %arg1, %c0_i32, %arg2 : i32, i32, i32, i32
  }
  func.func @transform_4(%arg0: i32, %arg1: i32, %arg2: i32) -> (i32, i32, i32, i32) {
    %c0_i32 = arith.constant 0 : i32
    %c0_i32_0 = arith.constant 0 : i32
    return %arg0, %arg1, %c0_i32, %arg2 : i32, i32, i32, i32
  }
}

module attributes {stable_mosaic.version = 11 : i64} {
  func.func @_prelu_norm_kernel(%arg0: i32, %arg1: i32, %arg2: i32, %arg3: memref<1x1x1xf32, #tpu.memory_space<vmem>>, %arg4: memref<1x2x1xf32, #tpu.memory_space<vmem>>, %arg5: memref<1x2x1xf32, #tpu.memory_space<vmem>>, %arg6: memref<1x1x2x256xf32, #tpu.memory_space<vmem>>, %arg7: memref<1x1x2x256xf32, #tpu.memory_space<vmem>>) attributes {dimension_semantics = [#tpu.dimension_semantics<parallel>, #tpu.dimension_semantics<parallel>, #tpu.dimension_semantics<parallel>], iteration_bounds = array<i64: 2, 4, 1>, scalar_prefetch = 0 : i64, scratch_operands = 0 : i64, tpu.core_type = #tpu.core_type<tc>, window_params = [{transform_indices = @transform_0, window_bounds = array<i64: 1, 1, 1>}, {transform_indices = @transform_1, window_bounds = array<i64: 1, 2, 1>}, {transform_indices = @transform_2, window_bounds = array<i64: 1, 2, 1>}, {transform_indices = @transform_3, window_bounds = array<i64: 1, 1, 2, 256>}, {transform_indices = @transform_4, window_bounds = array<i64: 1, 1, 2, 256>}]} {
    %c0 = arith.constant 0 : index
    %c0_0 = arith.constant 0 : index
    %c0_1 = arith.constant 0 : index
    %c0_2 = arith.constant 0 : index
    %0 = vector.load %arg6[%c0, %c0_0, %c0_1, %c0_2] : memref<1x1x2x256xf32, #tpu.memory_space<vmem>>, vector<1x1x2x256xf32>
    %1 = vector.shape_cast %0 : vector<1x1x2x256xf32> to vector<2x256xf32>
    %c0_3 = arith.constant 0 : index
    %c0_4 = arith.constant 0 : index
    %c0_5 = arith.constant 0 : index
    %2 = vector.load %arg3[%c0_3, %c0_4, %c0_5] : memref<1x1x1xf32, #tpu.memory_space<vmem>>, vector<1x1x1xf32>
    %3 = vector.shape_cast %2 : vector<1x1x1xf32> to vector<1x1xf32>
    %cst = arith.constant 0.000000e+00 : f32
    %4 = vector.broadcast %cst : f32 to vector<2x256xf32>
    %5 = arith.cmpf oge, %1, %4 : vector<2x256xf32>
    %6 = vector.broadcast %3 : vector<1x1xf32> to vector<2x256xf32>
    %7 = arith.mulf %6, %1 : vector<2x256xf32>
    %8 = arith.select %5, %1, %7 : vector<2x256xi1>, vector<2x256xf32>
    %cst_6 = arith.constant dense<0.000000e+00> : vector<256xf32>
    %9 = vector.multi_reduction <add>, %8, %cst_6 [0] : vector<2x256xf32> to vector<256xf32>
    %10 = vector.shape_cast %9 : vector<256xf32> to vector<1x256xf32>
    %cst_7 = arith.constant 2.000000e+00 : f32
    %11 = vector.broadcast %cst_7 : f32 to vector<1x256xf32>
    %12 = arith.divf %10, %11 : vector<1x256xf32>
    %13 = vector.broadcast %12 : vector<1x256xf32> to vector<2x256xf32>
    %14 = arith.subf %8, %13 : vector<2x256xf32>
    %15 = arith.mulf %14, %14 : vector<2x256xf32>
    %cst_8 = arith.constant dense<0.000000e+00> : vector<256xf32>
    %16 = vector.multi_reduction <add>, %15, %cst_8 [0] : vector<2x256xf32> to vector<256xf32>
    %17 = vector.shape_cast %16 : vector<256xf32> to vector<1x256xf32>
    %cst_9 = arith.constant 2.000000e+00 : f32
    %18 = vector.broadcast %cst_9 : f32 to vector<1x256xf32>
    %19 = arith.divf %17, %18 : vector<1x256xf32>
    %cst_10 = arith.constant 9.99999974E-6 : f32
    %20 = vector.broadcast %cst_10 : f32 to vector<1x256xf32>
    %21 = arith.addf %19, %20 : vector<1x256xf32>
    %22 = math.rsqrt %21 : vector<1x256xf32>
    %c0_11 = arith.constant 0 : index
    %c0_12 = arith.constant 0 : index
    %c0_13 = arith.constant 0 : index
    %23 = vector.load %arg4[%c0_11, %c0_12, %c0_13] : memref<1x2x1xf32, #tpu.memory_space<vmem>>, vector<1x2x1xf32>
    %24 = vector.shape_cast %23 : vector<1x2x1xf32> to vector<2x1xf32>
    %c0_14 = arith.constant 0 : index
    %c0_15 = arith.constant 0 : index
    %c0_16 = arith.constant 0 : index
    %25 = vector.load %arg5[%c0_14, %c0_15, %c0_16] : memref<1x2x1xf32, #tpu.memory_space<vmem>>, vector<1x2x1xf32>
    %26 = vector.shape_cast %25 : vector<1x2x1xf32> to vector<2x1xf32>
    %27 = vector.broadcast %12 : vector<1x256xf32> to vector<2x256xf32>
    %28 = arith.subf %8, %27 : vector<2x256xf32>
    %29 = vector.broadcast %22 : vector<1x256xf32> to vector<2x256xf32>
    %30 = arith.mulf %28, %29 : vector<2x256xf32>
    %31 = vector.broadcast %24 : vector<2x1xf32> to vector<2x256xf32>
    %32 = arith.mulf %30, %31 : vector<2x256xf32>
    %33 = vector.broadcast %26 : vector<2x1xf32> to vector<2x256xf32>
    %34 = arith.addf %32, %33 : vector<2x256xf32>
    %c0_17 = arith.constant 0 : index
    %c0_18 = arith.constant 0 : index
    %c0_19 = arith.constant 0 : index
    %c0_20 = arith.constant 0 : index
    %35 = vector.load %arg7[%c0_17, %c0_18, %c0_19, %c0_20] : memref<1x1x2x256xf32, #tpu.memory_space<vmem>>, vector<1x1x2x256xf32>
    %36 = vector.shape_cast %35 : vector<1x1x2x256xf32> to vector<2x256xf32>
    %37 = vector.shape_cast %34 : vector<2x256xf32> to vector<1x1x2x256xf32>
    tpu.vector_store %arg7[%c0_17, %c0_18, %c0_19, %c0_20], %37 {strides = array<i32>} : memref<1x1x2x256xf32, #tpu.memory_space<vmem>>, vector<1x1x2x256xf32>,
    return
  }
  func.func @transform_0(%arg0: i32, %arg1: i32, %arg2: i32) -> (i32, i32, i32) {
    %c0_i32 = arith.constant 0 : i32
    %c0_i32_0 = arith.constant 0 : i32
    %c0_i32_1 = arith.constant 0 : i32
    return %arg1, %c0_i32, %c0_i32_0 : i32, i32, i32
  }
  func.func @transform_1(%arg0: i32, %arg1: i32, %arg2: i32) -> (i32, i32, i32) {
    %c0_i32 = arith.constant 0 : i32
    %c0_i32_0 = arith.constant 0 : i32
    %c0_i32_1 = arith.constant 0 : i32
    return %arg1, %c0_i32, %c0_i32_0 : i32, i32, i32
  }
  func.func @transform_2(%arg0: i32, %arg1: i32, %arg2: i32) -> (i32, i32, i32) {
    %c0_i32 = arith.constant 0 : i32
    %c0_i32_0 = arith.constant 0 : i32
    %c0_i32_1 = arith.constant 0 : i32
    return %arg1, %c0_i32, %c0_i32_0 : i32, i32, i32
  }
  func.func @transform_3(%arg0: i32, %arg1: i32, %arg2: i32) -> (i32, i32, i32, i32) {
    %c0_i32 = arith.constant 0 : i32
    %c0_i32_0 = arith.constant 0 : i32
    return %arg0, %arg1, %c0_i32, %arg2 : i32, i32, i32, i32
  }
  func.func @transform_4(%arg0: i32, %arg1: i32, %arg2: i32) -> (i32, i32, i32, i32) {
    %c0_i32 = arith.constant 0 : i32
    %c0_i32_0 = arith.constant 0 : i32
    return %arg0, %arg1, %c0_i32, %arg2 : i32, i32, i32, i32
  }
}

module attributes {stable_mosaic.version = 11 : i64} {
  func.func @_causal_attn_kernel(%arg0: i32, %arg1: memref<1x16x64xf32, #tpu.memory_space<vmem>>, %arg2: memref<1x64x16xf32, #tpu.memory_space<vmem>>, %arg3: memref<1x16x32xf32, #tpu.memory_space<vmem>>, %arg4: memref<1x16x32xf32, #tpu.memory_space<vmem>>) attributes {dimension_semantics = [#tpu.dimension_semantics<parallel>], iteration_bounds = array<i64: 8>, scalar_prefetch = 0 : i64, scratch_operands = 0 : i64, tpu.core_type = #tpu.core_type<tc>, window_params = [{transform_indices = @transform_0, window_bounds = array<i64: 1, 16, 64>}, {transform_indices = @transform_1, window_bounds = array<i64: 1, 64, 16>}, {transform_indices = @transform_2, window_bounds = array<i64: 1, 16, 32>}, {transform_indices = @transform_3, window_bounds = array<i64: 1, 16, 32>}]} {
    %c0 = arith.constant 0 : index
    %c0_0 = arith.constant 0 : index
    %c0_1 = arith.constant 0 : index
    %0 = vector.load %arg1[%c0, %c0_0, %c0_1] : memref<1x16x64xf32, #tpu.memory_space<vmem>>, vector<1x16x64xf32>
    %1 = vector.shape_cast %0 : vector<1x16x64xf32> to vector<16x64xf32>
    %c0_2 = arith.constant 0 : index
    %c0_3 = arith.constant 0 : index
    %c0_4 = arith.constant 0 : index
    %2 = vector.load %arg2[%c0_2, %c0_3, %c0_4] : memref<1x64x16xf32, #tpu.memory_space<vmem>>, vector<1x64x16xf32>
    %3 = vector.shape_cast %2 : vector<1x64x16xf32> to vector<64x16xf32>
    %c0_5 = arith.constant 0 : index
    %c0_6 = arith.constant 0 : index
    %c0_7 = arith.constant 0 : index
    %4 = vector.load %arg3[%c0_5, %c0_6, %c0_7] : memref<1x16x32xf32, #tpu.memory_space<vmem>>, vector<1x16x32xf32>
    %5 = vector.shape_cast %4 : vector<1x16x32xf32> to vector<16x32xf32>
    %cst = arith.constant dense<0.000000e+00> : vector<16x16xf32>
    %6 = tpu.matmul %1, %3, %cst {dimension_numbers = #tpu.dot_dimension_numbers<[1], [0], [0], [1], [0, 0, 1, 1], [], []>} : vector<16x64xf32>, vector<64x16xf32>, vector<16x16xf32> -> vector<16x16xf32>
    %cst_8 = arith.constant 1.250000e-01 : f32
    %7 = vector.broadcast %cst_8 : f32 to vector<16x16xf32>
    %8 = arith.mulf %6, %7 : vector<16x16xf32>
    %9 = tpu.iota {dimensions = array<i32: 0>} : vector<16x16xi32>
    %10 = tpu.iota {dimensions = array<i32: 1>} : vector<16x16xi32>
    %11 = arith.cmpi sle, %10, %9 : vector<16x16xi32>
    %cst_9 = arith.constant -1.000000e+30 : f32
    %12 = vector.broadcast %cst_9 : f32 to vector<16x16xf32>
    %13 = arith.select %11, %8, %12 : vector<16x16xi1>, vector<16x16xf32>
    %cst_10 = arith.constant dense<0xFF800000> : vector<16xf32>
    %14 = vector.multi_reduction <maximumf>, %13, %cst_10 [1] : vector<16x16xf32> to vector<16xf32>
    %15 = vector.shape_cast %14 : vector<16xf32> to vector<16x1xf32>
    %16 = vector.broadcast %15 : vector<16x1xf32> to vector<16x16xf32>
    %17 = arith.subf %13, %16 : vector<16x16xf32>
    %18 = math.exp %17 : vector<16x16xf32>
    %cst_11 = arith.constant dense<0.000000e+00> : vector<16xf32>
    %19 = vector.multi_reduction <add>, %18, %cst_11 [1] : vector<16x16xf32> to vector<16xf32>
    %20 = vector.shape_cast %19 : vector<16xf32> to vector<16x1xf32>
    %21 = vector.broadcast %20 : vector<16x1xf32> to vector<16x16xf32>
    %22 = arith.divf %18, %21 : vector<16x16xf32>
    %cst_12 = arith.constant dense<0.000000e+00> : vector<16x32xf32>
    %23 = tpu.matmul %22, %5, %cst_12 {dimension_numbers = #tpu.dot_dimension_numbers<[1], [0], [0], [1], [0, 0, 1, 1], [], []>} : vector<16x16xf32>, vector<16x32xf32>, vector<16x32xf32> -> vector<16x32xf32>
    %c0_13 = arith.constant 0 : index
    %c0_14 = arith.constant 0 : index
    %c0_15 = arith.constant 0 : index
    %24 = vector.load %arg4[%c0_13, %c0_14, %c0_15] : memref<1x16x32xf32, #tpu.memory_space<vmem>>, vector<1x16x32xf32>
    %25 = vector.shape_cast %24 : vector<1x16x32xf32> to vector<16x32xf32>
    %26 = vector.shape_cast %23 : vector<16x32xf32> to vector<1x16x32xf32>
    tpu.vector_store %arg4[%c0_13, %c0_14, %c0_15], %26 {strides = array<i32>} : memref<1x16x32xf32, #tpu.memory_space<vmem>>, vector<1x16x32xf32>,
    return
  }
  func.func @transform_0(%arg0: i32) -> (i32, i32, i32) {
    %c0_i32 = arith.constant 0 : i32
    %c0_i32_0 = arith.constant 0 : i32
    %c0_i32_1 = arith.constant 0 : i32
    return %arg0, %c0_i32, %c0_i32_0 : i32, i32, i32
  }
  func.func @transform_1(%arg0: i32) -> (i32, i32, i32) {
    %c0_i32 = arith.constant 0 : i32
    %c0_i32_0 = arith.constant 0 : i32
    %c0_i32_1 = arith.constant 0 : i32
    return %arg0, %c0_i32, %c0_i32_0 : i32, i32, i32
  }
  func.func @transform_2(%arg0: i32) -> (i32, i32, i32) {
    %c0_i32 = arith.constant 0 : i32
    %c0_i32_0 = arith.constant 0 : i32
    %c0_i32_1 = arith.constant 0 : i32
    return %arg0, %c0_i32, %c0_i32_0 : i32, i32, i32
  }
  func.func @transform_3(%arg0: i32) -> (i32, i32, i32) {
    %c0_i32 = arith.constant 0 : i32
    %c0_i32_0 = arith.constant 0 : i32
    %c0_i32_1 = arith.constant 0 : i32
    return %arg0, %c0_i32, %c0_i32_0 : i32, i32, i32
  }
}

module attributes {stable_mosaic.version = 11 : i64} {
  func.func @_prelu_norm_kernel(%arg0: i32, %arg1: i32, %arg2: i32, %arg3: memref<1x1x1xf32, #tpu.memory_space<vmem>>, %arg4: memref<1x8x1xf32, #tpu.memory_space<vmem>>, %arg5: memref<1x8x1xf32, #tpu.memory_space<vmem>>, %arg6: memref<1x1x8x256xf32, #tpu.memory_space<vmem>>, %arg7: memref<1x1x8x256xf32, #tpu.memory_space<vmem>>) attributes {dimension_semantics = [#tpu.dimension_semantics<parallel>, #tpu.dimension_semantics<parallel>, #tpu.dimension_semantics<parallel>], iteration_bounds = array<i64: 2, 1, 1>, scalar_prefetch = 0 : i64, scratch_operands = 0 : i64, tpu.core_type = #tpu.core_type<tc>, window_params = [{transform_indices = @transform_0, window_bounds = array<i64: 1, 1, 1>}, {transform_indices = @transform_1, window_bounds = array<i64: 1, 8, 1>}, {transform_indices = @transform_2, window_bounds = array<i64: 1, 8, 1>}, {transform_indices = @transform_3, window_bounds = array<i64: 1, 1, 8, 256>}, {transform_indices = @transform_4, window_bounds = array<i64: 1, 1, 8, 256>}]} {
    %c0 = arith.constant 0 : index
    %c0_0 = arith.constant 0 : index
    %c0_1 = arith.constant 0 : index
    %c0_2 = arith.constant 0 : index
    %0 = vector.load %arg6[%c0, %c0_0, %c0_1, %c0_2] : memref<1x1x8x256xf32, #tpu.memory_space<vmem>>, vector<1x1x8x256xf32>
    %1 = vector.shape_cast %0 : vector<1x1x8x256xf32> to vector<8x256xf32>
    %c0_3 = arith.constant 0 : index
    %c0_4 = arith.constant 0 : index
    %c0_5 = arith.constant 0 : index
    %2 = vector.load %arg3[%c0_3, %c0_4, %c0_5] : memref<1x1x1xf32, #tpu.memory_space<vmem>>, vector<1x1x1xf32>
    %3 = vector.shape_cast %2 : vector<1x1x1xf32> to vector<1x1xf32>
    %cst = arith.constant 0.000000e+00 : f32
    %4 = vector.broadcast %cst : f32 to vector<8x256xf32>
    %5 = arith.cmpf oge, %1, %4 : vector<8x256xf32>
    %6 = vector.broadcast %3 : vector<1x1xf32> to vector<8x256xf32>
    %7 = arith.mulf %6, %1 : vector<8x256xf32>
    %8 = arith.select %5, %1, %7 : vector<8x256xi1>, vector<8x256xf32>
    %cst_6 = arith.constant dense<0.000000e+00> : vector<256xf32>
    %9 = vector.multi_reduction <add>, %8, %cst_6 [0] : vector<8x256xf32> to vector<256xf32>
    %10 = vector.shape_cast %9 : vector<256xf32> to vector<1x256xf32>
    %cst_7 = arith.constant 8.000000e+00 : f32
    %11 = vector.broadcast %cst_7 : f32 to vector<1x256xf32>
    %12 = arith.divf %10, %11 : vector<1x256xf32>
    %13 = vector.broadcast %12 : vector<1x256xf32> to vector<8x256xf32>
    %14 = arith.subf %8, %13 : vector<8x256xf32>
    %15 = arith.mulf %14, %14 : vector<8x256xf32>
    %cst_8 = arith.constant dense<0.000000e+00> : vector<256xf32>
    %16 = vector.multi_reduction <add>, %15, %cst_8 [0] : vector<8x256xf32> to vector<256xf32>
    %17 = vector.shape_cast %16 : vector<256xf32> to vector<1x256xf32>
    %cst_9 = arith.constant 8.000000e+00 : f32
    %18 = vector.broadcast %cst_9 : f32 to vector<1x256xf32>
    %19 = arith.divf %17, %18 : vector<1x256xf32>
    %cst_10 = arith.constant 9.99999974E-6 : f32
    %20 = vector.broadcast %cst_10 : f32 to vector<1x256xf32>
    %21 = arith.addf %19, %20 : vector<1x256xf32>
    %22 = math.rsqrt %21 : vector<1x256xf32>
    %c0_11 = arith.constant 0 : index
    %c0_12 = arith.constant 0 : index
    %c0_13 = arith.constant 0 : index
    %23 = vector.load %arg4[%c0_11, %c0_12, %c0_13] : memref<1x8x1xf32, #tpu.memory_space<vmem>>, vector<1x8x1xf32>
    %24 = vector.shape_cast %23 : vector<1x8x1xf32> to vector<8x1xf32>
    %c0_14 = arith.constant 0 : index
    %c0_15 = arith.constant 0 : index
    %c0_16 = arith.constant 0 : index
    %25 = vector.load %arg5[%c0_14, %c0_15, %c0_16] : memref<1x8x1xf32, #tpu.memory_space<vmem>>, vector<1x8x1xf32>
    %26 = vector.shape_cast %25 : vector<1x8x1xf32> to vector<8x1xf32>
    %27 = vector.broadcast %12 : vector<1x256xf32> to vector<8x256xf32>
    %28 = arith.subf %8, %27 : vector<8x256xf32>
    %29 = vector.broadcast %22 : vector<1x256xf32> to vector<8x256xf32>
    %30 = arith.mulf %28, %29 : vector<8x256xf32>
    %31 = vector.broadcast %24 : vector<8x1xf32> to vector<8x256xf32>
    %32 = arith.mulf %30, %31 : vector<8x256xf32>
    %33 = vector.broadcast %26 : vector<8x1xf32> to vector<8x256xf32>
    %34 = arith.addf %32, %33 : vector<8x256xf32>
    %c0_17 = arith.constant 0 : index
    %c0_18 = arith.constant 0 : index
    %c0_19 = arith.constant 0 : index
    %c0_20 = arith.constant 0 : index
    %35 = vector.load %arg7[%c0_17, %c0_18, %c0_19, %c0_20] : memref<1x1x8x256xf32, #tpu.memory_space<vmem>>, vector<1x1x8x256xf32>
    %36 = vector.shape_cast %35 : vector<1x1x8x256xf32> to vector<8x256xf32>
    %37 = vector.shape_cast %34 : vector<8x256xf32> to vector<1x1x8x256xf32>
    tpu.vector_store %arg7[%c0_17, %c0_18, %c0_19, %c0_20], %37 {strides = array<i32>} : memref<1x1x8x256xf32, #tpu.memory_space<vmem>>, vector<1x1x8x256xf32>,
    return
  }
  func.func @transform_0(%arg0: i32, %arg1: i32, %arg2: i32) -> (i32, i32, i32) {
    %c0_i32 = arith.constant 0 : i32
    %c0_i32_0 = arith.constant 0 : i32
    %c0_i32_1 = arith.constant 0 : i32
    return %arg1, %c0_i32, %c0_i32_0 : i32, i32, i32
  }
  func.func @transform_1(%arg0: i32, %arg1: i32, %arg2: i32) -> (i32, i32, i32) {
    %c0_i32 = arith.constant 0 : i32
    %c0_i32_0 = arith.constant 0 : i32
    %c0_i32_1 = arith.constant 0 : i32
    return %arg1, %c0_i32, %c0_i32_0 : i32, i32, i32
  }
  func.func @transform_2(%arg0: i32, %arg1: i32, %arg2: i32) -> (i32, i32, i32) {
    %c0_i32 = arith.constant 0 : i32
    %c0_i32_0 = arith.constant 0 : i32
    %c0_i32_1 = arith.constant 0 : i32
    return %arg1, %c0_i32, %c0_i32_0 : i32, i32, i32
  }
  func.func @transform_3(%arg0: i32, %arg1: i32, %arg2: i32) -> (i32, i32, i32, i32) {
    %c0_i32 = arith.constant 0 : i32
    %c0_i32_0 = arith.constant 0 : i32
    return %arg0, %arg1, %c0_i32, %arg2 : i32, i32, i32, i32
  }
  func.func @transform_4(%arg0: i32, %arg1: i32, %arg2: i32) -> (i32, i32, i32, i32) {
    %c0_i32 = arith.constant 0 : i32
    %c0_i32_0 = arith.constant 0 : i32
    return %arg0, %arg1, %c0_i32, %arg2 : i32, i32, i32, i32
  }
}

</mosaic_0001>

<bundles_post_ra>
// kernel: gridnetv3_block_forward.7
= control target key start
LH: loop header
LB: loop body
LE: loop exit
PB: predicated region body
PF: predicated region fallthrough
CT: control target
= control target key end

     0   :  { %s702_s17 = smov 0   ;;  %s704_s18 = smov 0   ;;  %s748_s0 = inlined_call_operand.<no memory space> [shape: f32[1,1,1], index: 0, kind: input, shape index: {}]   ;;  %s749_s1 = inlined_call_operand.vmem [shape: f32[1,8,1], index: 1, kind: input, shape index: {}]   ;;  %s750_s2 = inlined_call_operand.vmem [shape: f32[1,8,1], index: 2, kind: input, shape index: {}]   ;;  %s751_s3 = inlined_call_operand.vmem [shape: f32[1,1,8,1024], index: 3, kind: input, shape index: {}]   ;;  %s752_s4 = inlined_call_operand.vmem [shape: f32[1,1,8,1024], index: 4, kind: output, shape index: {}]  }
   0x1   :  { %v9_v0 = vstv %s748_s0  ;;  %s706_s19 = smov 0  }
   0x2   :  { %10 = vst [vmem:[#allocation2] sm:$0x1] %v9_v0 }
   0x3 LB: > { %s28_s0 = sadd.s32 1, %s667_s18  ;;  %p606_p0 = scmp.ge.s32.totalorder %s671_s19, 1  ;;  %s671_s19 = sphi %s706_s19, %s16_s19   ;;  %s667_s18 = sphi %s704_s18, %s754_s18   ;;  %s663_s17 = sphi %s702_s17, %s753_s17  }
   0x4   : > { %p29_p1 = scmp.ge.s32.totalorder %s28_s0, 2  ;;  %p226_p2 = scmp.lt.s32.totalorder %s671_s19, 3 }
   0x6   : > { %s756_s0 = smov (%p29_p1, %s28_s0), 0  ;;  %p227_p3 = pnand %p606_p0, %p226_p2 }
   0x7   : > { %s607_s24 = sshll.u32 (!%p227_p3), %s663_s17, 2 }
   0x8   : > { %230 = sbr.rel (%p227_p3) target bundleno = 200 (0xc8), region = 36  ;;  %p295_p4 = scmp.lt.s32.totalorder (!%p227_p3), %s607_s24, 7 }
   0xd   : > { %v611_v1 = vld [vmem:[#allocation2] ss:$0 sm:$0xff]  ;;  %v673_v3 = vmov 0   ;;  %s758_s24 = smov (!%p295_p4, %s607_s24), 7 }
   0xe   : > { %v418_v2 = vld [vmem:[%s750_s2] sm:$0xff]  ;;  %639 = vset.pattern.permute.xlu0 %v673_v3  ;;  %640 = vset.pattern.permute.xlu1 %v673_v3  ;;  %s608_s25 = sshll.u32 %s758_s24, 3 }
   0xf   : > { %333 = vperm.xlu0 %639, %v611_v1   ;;  %434 = vperm.xlu1 %640, %v418_v2   ;;  %v417_v4 = vld [vmem:[%s749_s1] sm:$0xff]  ;;  %s302_s28 = scalar_lea.vmem %s751_s3, %s608_s25  ;;  %s316_s5 = scalar_lea.vmem %s752_s4, %s608_s25 }
  0x10   : > { %v318_v5 = vld [vmem:[%s302_s28] sm:$0xff]  ;;  %v319_v6 = vld [vmem:[%s302_s28 + $0x8] sm:$0xff]  ;;  %v320_v7 = vld [vmem:[%s302_s28 + $0x10] sm:$0xff] }
  0x11   : > { %v321_v8 = vld [vmem:[%s302_s28 + $0x18] sm:$0xff]  ;;  %vm323_vm0 = vcmp.ge.f32.partialorder %v318_v5, 0.0  ;;  %vm324_vm1 = vcmp.ge.f32.partialorder %v319_v6, 0.0  ;;  %vm325_vm2 = vcmp.ge.f32.partialorder %v320_v7, 0.0 }
  0x12   : > { %vm326_vm3 = vcmp.ge.f32.partialorder %v321_v8, 0.0 }
  0x13   : > { %425 = vperm.xlu0 %639, %v417_v4  }
  0x8a   : > { %v334_v9 = vpop.permute.xlu0 %333 }
  0x8b   : > { %v336_v10 = vmul.f32 %v334_v9, %v318_v5  ;;  %v337_v11 = vmul.f32 %v334_v9, %v319_v6  ;;  %v338_v12 = vmul.f32 %v334_v9, %v320_v7  ;;  %v339_v13 = vmul.f32 %v334_v9, %v321_v8 }
  0x8d   : > { %v340_v14 = vsel %vm323_vm0, %v318_v5, %v336_v10  ;;  %v341_v15 = vsel %vm324_vm1, %v319_v6, %v337_v11  ;;  %v342_v16 = vsel %vm325_vm2, %v320_v7, %v338_v12  ;;  %v343_v17 = vsel %vm326_vm3, %v321_v8, %v339_v13 }
  0x8e   : > { %v344_v18 = vrot.slane %v340_v14, 4  ;;  %v350_v19 = vrot.slane %v341_v15, 4  ;;  %v356_v20 = vrot.slane %v342_v16, 4  ;;  %v362_v21 = vrot.slane %v343_v17, 4 }
  0x90   : > { %v345_v22 = vadd.f32 %v344_v18, %v340_v14  ;;  %v351_v23 = vadd.f32 %v350_v19, %v341_v15  ;;  %v357_v24 = vadd.f32 %v356_v20, %v342_v16  ;;  %v363_v25 = vadd.f32 %v362_v21, %v343_v17 }
  0x92   : > { %v346_v26 = vrot.slane %v345_v22, 2  ;;  %v352_v27 = vrot.slane %v351_v23, 2  ;;  %v358_v28 = vrot.slane %v357_v24, 2  ;;  %v364_v29 = vrot.slane %v363_v25, 2 }
  0x94   : > { %v347_v30 = vadd.f32 %v346_v26, %v345_v22  ;;  %v353_v31 = vadd.f32 %v352_v27, %v351_v23  ;;  %v359_v32 = vadd.f32 %v358_v28, %v357_v24  ;;  %v365_v33 = vadd.f32 %v364_v29, %v363_v25  ;;  %v426_v26 = vpop.permute.xlu0 %425  ;;  %v435_v28 = vpop.permute.xlu1 %434 }
  0x96   : > { %v348_v34 = vrot.slane %v347_v30, 1  ;;  %v354_v35 = vrot.slane %v353_v31, 1  ;;  %v360_v36 = vrot.slane %v359_v32, 1  ;;  %v366_v37 = vrot.slane %v365_v33, 1 }
  0x98   : > { %v349_v38 = vadd.f32 %v348_v34, %v347_v30  ;;  %v355_v39 = vadd.f32 %v354_v35, %v353_v31  ;;  %v361_v40 = vadd.f32 %v360_v36, %v359_v32  ;;  %v367_v41 = vadd.f32 %v366_v37, %v365_v33 }
  0x9a   : > { %v369_v42 = vmul.f32 0.125, %v349_v38  ;;  %v370_v43 = vmul.f32 0.125, %v355_v39  ;;  %v371_v44 = vmul.f32 0.125, %v361_v40  ;;  %v372_v45 = vmul.f32 0.125, %v367_v41 }
  0x9c   : > { %v373_v46 = vsub.f32 %v340_v14, %v369_v42  ;;  %v374_v47 = vsub.f32 %v341_v15, %v370_v43  ;;  %v375_v48 = vsub.f32 %v342_v16, %v371_v44  ;;  %v376_v49 = vsub.f32 %v343_v17, %v372_v45 }
  0x9e   : > { %v377_v50 = vmul.f32 %v373_v46, %v373_v46  ;;  %v378_v51 = vmul.f32 %v374_v47, %v374_v47  ;;  %v379_v52 = vmul.f32 %v375_v48, %v375_v48  ;;  %v380_v53 = vmul.f32 %v376_v49, %v376_v49 }
  0xa0   : > { %v381_v54 = vrot.slane %v377_v50, 4  ;;  %v387_v55 = vrot.slane %v378_v51, 4  ;;  %v393_v56 = vrot.slane %v379_v52, 4  ;;  %v399_v57 = vrot.slane %v380_v53, 4 }
  0xa2   : > { %v382_v58 = vadd.f32 %v381_v54, %v377_v50  ;;  %v388_v59 = vadd.f32 %v387_v55, %v378_v51  ;;  %v394_v60 = vadd.f32 %v393_v56, %v379_v52  ;;  %v400_v61 = vadd.f32 %v399_v57, %v380_v53 }
  0xa4   : > { %v383_v62 = vrot.slane %v382_v58, 2  ;;  %v389_v63 = vrot.slane %v388_v59, 2  ;;  %v395_v0 = vrot.slane %v394_v60, 2  ;;  %v401_v1 = vrot.slane %v400_v61, 2 }
  0xa6   : > { %v384_v2 = vadd.f32 %v383_v62, %v382_v58  ;;  %v390_v3 = vadd.f32 %v389_v63, %v388_v59  ;;  %v396_v4 = vadd.f32 %v395_v0, %v394_v60  ;;  %v402_v5 = vadd.f32 %v401_v1, %v400_v61 }
  0xa8   : > { %v385_v6 = vrot.slane %v384_v2, 1  ;;  %v391_v7 = vrot.slane %v390_v3, 1  ;;  %v397_v8 = vrot.slane %v396_v4, 1  ;;  %v403_v9 = vrot.slane %v402_v5, 1 }
  0xaa   : > { %v386_v10 = vadd.f32 %v385_v6, %v384_v2  ;;  %v392_v11 = vadd.f32 %v391_v7, %v390_v3  ;;  %v398_v12 = vadd.f32 %v397_v8, %v396_v4  ;;  %v404_v13 = vadd.f32 %v403_v9, %v402_v5 }
  0xac   : > { %v405_v14 = vmul.f32 0.125, %v386_v10  ;;  %v406_v15 = vmul.f32 0.125, %v392_v11  ;;  %v407_v16 = vmul.f32 0.125, %v398_v12  ;;  %v408_v17 = vmul.f32 0.125, %v404_v13 }
  0xae   : > { %v409_v18 = vadd.f32 1e-05, %v405_v14  ;;  %v410_v19 = vadd.f32 1e-05, %v406_v15  ;;  %v411_v20 = vadd.f32 1e-05, %v407_v16 }
  0xaf   : > { %v412_v21 = vadd.f32 1e-05, %v408_v17 }
  0xb0   : > { %641 = vrsqrt.f32 %v409_v18 }
  0xb1   : > { %643 = vrsqrt.f32 %v410_v19 }
  0xb2   : > { %645 = vrsqrt.f32 %v411_v20 }
  0xb3   : > { %647 = vrsqrt.f32 %v412_v21 }
  0xbd   : > { %v642_v22 = vpop.eup %641 }
  0xbe   : > { %v644_v23 = vpop.eup %643  ;;  %v419_v24 = vmul.f32 %v642_v22, %v373_v46 }
  0xbf   : > { %v646_v25 = vpop.eup %645  ;;  %v420_v27 = vmul.f32 %v644_v23, %v374_v47 }
  0xc0   : > { %v648_v29 = vpop.eup %647  ;;  %v421_v30 = vmul.f32 %v646_v25, %v375_v48  ;;  %v428_v31 = vmul.f32 %v426_v26, %v419_v24 }
  0xc1   : > { %v422_v32 = vmul.f32 %v648_v29, %v376_v49  ;;  %v429_v33 = vmul.f32 %v426_v26, %v420_v27 }
  0xc2   : > { %v430_v34 = vmul.f32 %v426_v26, %v421_v30  ;;  %v437_v35 = vadd.f32 %v435_v28, %v428_v31 }
  0xc3   : > { %v431_v36 = vmul.f32 %v426_v26, %v422_v32  ;;  %v438_v37 = vadd.f32 %v435_v28, %v429_v33 }
  0xc4   : > { %v439_v38 = vadd.f32 %v435_v28, %v430_v34  ;;  %441 = vst [vmem:[%s316_s5] sm:$0xff] %v437_v35 }
  0xc5   : > { %v440_v39 = vadd.f32 %v435_v28, %v431_v36  ;;  %442 = vst [vmem:[%s316_s5 + $0x8] sm:$0xff] %v438_v37 }
  0xc6   : > { %443 = vst [vmem:[%s316_s5 + $0x10] sm:$0xff] %v439_v38 }
  0xc7   : > { %444 = vst [vmem:[%s316_s5 + $0x18] sm:$0xff] %v440_v39 }
  0xc8 PF: > { %s16_s19 = sadd.s32 1, %s671_s19   ;;  %s753_s17 = smov %s667_s18 }
  0xc9   : > { %p13_p5 = scmp.ge.s32.totalorder %s16_s19, 4   ;;  %s754_s18 = smov %s756_s0 }
  0xcb   :  { %15 = sbr.rel (!%p13_p5) target bundleno = 3 (0x3), region = 75 }

// kernel: custom-call.3
= control target key start
LH: loop header
LB: loop body
LE: loop exit
PB: predicated region body
PF: predicated region fallthrough
CT: control target
= control target key end

     0   :  { %s6_s0 = inlined_call_operand.vmem [shape: f32[44,16], index: 0, kind: output, shape index: {}]  }

// kernel: custom-call.2
= control target key start
LH: loop header
LB: loop body
LE: loop exit
PB: predicated region body
PF: predicated region fallthrough
CT: control target
= control target key end

     0   :  { %s6_s0 = inlined_call_operand.vmem [shape: bf16[44,16], index: 0, kind: output, shape index: {}]  }

// kernel: custom-call.10
= control target key start
LH: loop header
LB: loop body
LE: loop exit
PB: predicated region body
PF: predicated region fallthrough
CT: control target
= control target key end

     0   :  { %s6_s0 = inlined_call_operand.vmem [shape: bf16[19,44,16], index: 0, kind: output, shape index: {}]  }

// kernel: gridnetv3_block_forward.9
= control target key start
LH: loop header
LB: loop body
LE: loop exit
PB: predicated region body
PF: predicated region fallthrough
CT: control target
= control target key end

     0   :  { %s693_s15 = smov 0   ;;  %s695_s16 = smov 0   ;;  %s768_s0 = inlined_call_operand.vmem [shape: f32[4,1,1], index: 0, kind: input, shape index: {}]   ;;  %s769_s1 = inlined_call_operand.vmem [shape: f32[4,4,1], index: 1, kind: input, shape index: {}]   ;;  %s770_s2 = inlined_call_operand.vmem [shape: f32[4,4,1], index: 2, kind: input, shape index: {}]   ;;  %s771_s3 = inlined_call_operand.vmem [shape: f32[2,4,4,256], index: 3, kind: input, shape index: {}]   ;;  %s772_s4 = inlined_call_operand.vmem [shape: f32[2,4,4,256], index: 4, kind: output, shape index: {}]  }
   0x1   :  { %s697_s17 = smov 0   ;;  %s699_s18 = smov 0  }
   0x2   :  { %s701_s19 = smov 0  }
   0x3 LB: > { %s29_s20 = sadd.s32 1, %s656_s17  ;;  %s33_s21 = sadd.s32 1, %s660_s18  ;;  %s664_s19 = sphi %s701_s19, %s14_s19   ;;  %s660_s18 = sphi %s699_s18, %s776_s18   ;;  %s656_s17 = sphi %s697_s17, %s775_s17   ;;  %s652_s16 = sphi %s695_s16, %s774_s16   ;;  %s648_s15 = sphi %s693_s15, %s773_s15  }
   0x4   : > { %p31_p0 = scmp.ge.s32.totalorder %s29_s20, 4  ;;  %p566_p1 = scmp.ge.s32.totalorder %s664_s19, 1 }
   0x5   : > { %p224_p2 = scmp.lt.s32.totalorder %s664_s19, 9 }
   0x6   : > { %s778_s20 = smov (%p31_p0, %s29_s20), 0  ;;  %s780_s21 = smov (!%p31_p0, %s33_s21), %s660_s18 }
   0x7   : > { %p225_p3 = pnand %p566_p1, %p224_p2  ;;  %p35_p4 = scmp.ge.s32.totalorder %s780_s21, 2 }
   0x8   : > { %p277_p5 = scmp.lt.s32.totalorder (!%p225_p3), %s648_s15, 3  ;;  %p289_p6 = scmp.lt.s32.totalorder (!%p225_p3), %s652_s16, 1 }
   0x9   : > { %s782_s21 = smov (%p35_p4, %s780_s21), 0  ;;  %228 = sbr.rel (%p225_p3) target bundleno = 209 (0xd1), region = 36 }
   0xe   : > { %v666_v0 = vmov 0   ;;  %s784_s15 = smov (!%p277_p5, %s648_s15), 3  ;;  %s786_s16 = smov (!%p289_p6, %s652_s16), 1  ;;  %vm333_vm1 = vcmask 1043456   ;;  %v667_v47 = vmov 839922192   ;;  %v394_v49 = vlaneseq }
   0xf   : > { %620 = vset.pattern.permute.xlu0 %v666_v0  ;;  %621 = vset.pattern.permute.xlu1 %v666_v0  ;;  %s279_s24 = scalar_lea.vmem %s768_s0, %s784_s15  ;;  %s567_s25 = sshll.u32 %s784_s15, 2  ;;  %v392_v48 = vunpack.c.l.s4 %v667_v47 }
  0x10   : > { %v575_v1 = vld [vmem:[%s279_s24] ss:$0 sm:$0xff]  ;;  %s283_s28 = scalar_lea.vmem %s769_s1, %s567_s25  ;;  %s287_s5 = scalar_lea.vmem %s770_s2, %s567_s25  ;;  %v395_v51 = vshrl.u32 %v394_v49, 7 }
  0x11   : > { %325 = vperm.xlu0 %620, %v575_v1   ;;  %v381_v2 = vld [vmem:[%s287_s5] sm:$0xf]  ;;  %s569_s6 = sshll.u32 %s784_s15, 1  ;;  %s570_s7 = sshll.u32 %s786_s16, 3  ;;  %v393_v50 = vunpack.c.0.s8 %v392_v48 }
  0x12   : > { %v380_v3 = vld [vmem:[%s283_s28] sm:$0xf]  ;;  %402 = vperm.xlu1 %621, %v381_v2   ;;  %s736_s8 = sadd.s32 %s570_s7, %s569_s6 }
  0x13   : > { %s571_s9 = sshll.u32 %s736_s8, 2  ;;  %v396_v53 = vsub.s32 %v393_v50, %v395_v51 }
  0x14   : > { %s300_s12 = scalar_lea.vmem %s771_s3, %s571_s9  ;;  %s314_s15 = scalar_lea.vmem %s772_s4, %s571_s9 }
  0x15   : > { %389 = vperm.xlu0 %620, %v380_v3   ;;  %v316_v4 = vld [vmem:[%s300_s12] sm:$0xff] }
  0x16   : > { %vm318_vm0 = vcmp.ge.f32.partialorder %v316_v4, 0.0 }
  0x8c   : > { %v326_v5 = vpop.permute.xlu0 %325 }
  0x8d   : > { %v328_v6 = vmul.f32 %v326_v5, %v316_v4  ;;  %v403_v56 = vpop.permute.xlu1 %402 }
  0x8e   : > { %v410_v60 = vrot.slane %v403_v56, %v396_v53 }
  0x8f   : > { %v329_v7 = vsel %vm318_vm0, %v316_v4, %v328_v6 }
  0x90   : > { %v331_v8 = vcombine.high %v329_v7, %v329_v7  ;;  %v334_v9 = vsel %vm333_vm1, %v329_v7, 0.0  ;;  %v390_v55 = vpop.permute.xlu0 %389 }
  0x91   : > { %v335_v10 = vrot.slane %v334_v9, 4  ;;  %v397_v59 = vrot.slane %v390_v55, %v396_v53 }
  0x92   : > { %v341_v11 = vsel %vm333_vm1, %v331_v8, 0.0 }
  0x93   : > { %v336_v12 = vadd.f32 %v335_v10, %v334_v9  ;;  %v342_v13 = vrot.slane %v341_v11, 4 }
  0x95   : > { %v337_v14 = vrot.slane %v336_v12, 2  ;;  %v343_v15 = vadd.f32 %v342_v13, %v341_v11 }
  0x97   : > { %v338_v16 = vadd.f32 %v337_v14, %v336_v12  ;;  %v344_v17 = vrot.slane %v343_v15, 2 }
  0x99   : > { %v339_v18 = vrot.slane %v338_v16, 1  ;;  %v345_v19 = vadd.f32 %v344_v17, %v343_v15 }
  0x9b   : > { %v340_v20 = vadd.f32 %v339_v18, %v338_v16  ;;  %v346_v21 = vrot.slane %v345_v19, 1 }
  0x9d   : > { %v347_v22 = vadd.f32 %v346_v21, %v345_v19  ;;  %v349_v23 = vmul.f32 0.25, %v340_v20 }
  0x9f   : > { %v350_v24 = vmul.f32 0.25, %v347_v22 }
  0xa1   : > { %v353_v25 = vcombine.low %v349_v23, %v350_v24 }
  0xa3   : > { %v355_v26 = vsub.f32 %v329_v7, %v353_v25 }
  0xa5   : > { %v356_v27 = vmul.f32 %v355_v26, %v355_v26 }
  0xa7   : > { %v358_v28 = vcombine.high %v356_v27, %v356_v27  ;;  %v360_v29 = vsel %vm333_vm1, %v356_v27, 0.0 }
  0xa8   : > { %v361_v30 = vrot.slane %v360_v29, 4 }
  0xa9   : > { %v367_v31 = vsel %vm333_vm1, %v358_v28, 0.0 }
  0xaa   : > { %v362_v32 = vadd.f32 %v361_v30, %v360_v29  ;;  %v368_v33 = vrot.slane %v367_v31, 4 }
  0xac   : > { %v363_v34 = vrot.slane %v362_v32, 2  ;;  %v369_v35 = vadd.f32 %v368_v33, %v367_v31 }
  0xae   : > { %v364_v36 = vadd.f32 %v363_v34, %v362_v32  ;;  %v370_v37 = vrot.slane %v369_v35, 2 }
  0xb0   : > { %v365_v38 = vrot.slane %v364_v36, 1  ;;  %v371_v39 = vadd.f32 %v370_v37, %v369_v35 }
  0xb2   : > { %v366_v40 = vadd.f32 %v365_v38, %v364_v36  ;;  %v372_v41 = vrot.slane %v371_v39, 1 }
  0xb4   : > { %v373_v42 = vadd.f32 %v372_v41, %v371_v39  ;;  %v374_v43 = vmul.f32 0.25, %v366_v40 }
  0xb6   : > { %v375_v44 = vmul.f32 0.25, %v373_v42  ;;  %v376_v45 = vadd.f32 1e-05, %v374_v43 }
  0xb8   : > { %v377_v46 = vadd.f32 1e-05, %v375_v44  ;;  %622 = vrsqrt.f32 %v376_v45 }
  0xba   : > { %624 = vrsqrt.f32 %v377_v46 }
  0xc5   : > { %v623_v52 = vpop.eup %622 }
  0xc7   : > { %v625_v54 = vpop.eup %624 }
  0xc8   : > { %v384_v57 = vcombine.low %v623_v52, %v625_v54 }
  0xca   : > { %v386_v58 = vmul.f32 %v384_v57, %v355_v26 }
  0xcc   : > { %v399_v61 = vmul.f32 %v397_v59, %v386_v58 }
  0xce   : > { %v412_v62 = vadd.f32 %v410_v60, %v399_v61 }
  0xd0   : > { %413 = vst [vmem:[%s314_s15] sm:$0xff] %v412_v62 }
  0xd1 PF: > { %s14_s19 = sadd.s32 1, %s664_s19   ;;  %s773_s15 = smov %s656_s17 }
  0xd2   : > { %p11_p7 = scmp.ge.s32.totalorder %s14_s19, 10   ;;  %s774_s16 = smov %s660_s18 }
  0xd3   : > { %s775_s17 = smov %s778_s20  ;;  %s776_s18 = smov %s782_s21 }
  0xd4   :  { %13 = sbr.rel (!%p11_p7) target bundleno = 3 (0x3), region = 75 }

// kernel: gridnetv3_block_forward.11
= control target key start
LH: loop header
LB: loop body
LE: loop exit
PB: predicated region body
PF: predicated region fallthrough
CT: control target
= control target key end

     0   :  { %s725_s15 = smov 0   ;;  %s727_s16 = smov 0   ;;  %s800_s0 = inlined_call_operand.vmem [shape: f32[4,1,1], index: 0, kind: input, shape index: {}]   ;;  %s801_s1 = inlined_call_operand.vmem [shape: f32[4,2,1], index: 1, kind: input, shape index: {}]   ;;  %s802_s2 = inlined_call_operand.vmem [shape: f32[4,2,1], index: 2, kind: input, shape index: {}]   ;;  %s803_s3 = inlined_call_operand.vmem [shape: f32[2,4,2,256], index: 3, kind: input, shape index: {}]   ;;  %s804_s4 = inlined_call_operand.vmem [shape: f32[2,4,2,256], index: 4, kind: output, shape index: {}]  }
   0x1   :  { %s729_s17 = smov 0   ;;  %s731_s18 = smov 0  }
   0x2   :  { %s733_s19 = smov 0  }
   0x3 LB: > { %s29_s20 = sadd.s32 1, %s687_s17  ;;  %s33_s21 = sadd.s32 1, %s691_s18  ;;  %s695_s19 = sphi %s733_s19, %s14_s19   ;;  %s691_s18 = sphi %s731_s18, %s808_s18   ;;  %s687_s17 = sphi %s729_s17, %s807_s17   ;;  %s683_s16 = sphi %s727_s16, %s806_s16   ;;  %s679_s15 = sphi %s725_s15, %s805_s15  }
   0x4   : > { %p31_p0 = scmp.ge.s32.totalorder %s29_s20, 4  ;;  %p596_p1 = scmp.ge.s32.totalorder %s695_s19, 1 }
   0x5   : > { %p224_p2 = scmp.lt.s32.totalorder %s695_s19, 9 }
   0x6   : > { %s810_s20 = smov (%p31_p0, %s29_s20), 0  ;;  %s812_s21 = smov (!%p31_p0, %s33_s21), %s691_s18 }
   0x7   : > { %p225_p3 = pnand %p596_p1, %p224_p2  ;;  %p35_p4 = scmp.ge.s32.totalorder %s812_s21, 2 }
   0x8   : > { %p277_p5 = scmp.lt.s32.totalorder (!%p225_p3), %s679_s15, 3  ;;  %p289_p6 = scmp.lt.s32.totalorder (!%p225_p3), %s683_s16, 1 }
   0x9   : > { %s814_s21 = smov (%p35_p4, %s812_s21), 0  ;;  %228 = sbr.rel (%p225_p3) target bundleno = 217 (0xd9), region = 36 }
   0xe   : > { %v697_v0 = vmov 0   ;;  %s816_s15 = smov (!%p277_p5, %s679_s15), 3  ;;  %s818_s16 = smov (!%p289_p6, %s683_s16), 1  ;;  %v698_v4 = vmov 1983009808   ;;  %v334_v6 = vlaneseq  ;;  %vm341_vm1 = vcmask 1041408  }
   0xf   : > { %651 = vset.pattern.permute.xlu0 %v697_v0  ;;  %652 = vset.pattern.permute.xlu1 %v697_v0  ;;  %s279_s24 = scalar_lea.vmem %s800_s0, %s816_s15  ;;  %s597_s25 = sshll.u32 %s816_s15, 1  ;;  %v332_v5 = vunpack.c.l.s4 %v698_v4  ;;  %v699_v56 = vmov 269488144  }
  0x10   : > { %v605_v1 = vld [vmem:[%s279_s24] ss:$0 sm:$0xff]  ;;  %s283_s28 = scalar_lea.vmem %s801_s1, %s597_s25  ;;  %s287_s5 = scalar_lea.vmem %s802_s2, %s597_s25  ;;  %v335_v8 = vshrl.u32 %v334_v6, 7  ;;  %v422_v57 = vunpack.c.l.s4 %v699_v56 }
  0x11   : > { %325 = vperm.xlu0 %651, %v605_v1   ;;  %v404_v2 = vld [vmem:[%s287_s5] sm:$0x3]  ;;  %s600_s6 = sshll.u32 %s818_s16, 3  ;;  %v333_v7 = vunpack.c.0.s8 %v332_v5 }
  0x12   : > { %v403_v3 = vld [vmem:[%s283_s28] sm:$0x3]  ;;  %432 = vperm.xlu1 %652, %v404_v2   ;;  %s768_s7 = sadd.s32 %s600_s6, %s597_s25  ;;  %v423_v58 = vunpack.c.0.s8 %v422_v57 }
  0x13   : > { %s601_s8 = sshll.u32 %s768_s7, 1  ;;  %v336_v11 = vsub.s32 %v333_v7, %v335_v8 }
  0x14   : > { %s300_s11 = scalar_lea.vmem %s803_s3, %s601_s8  ;;  %v426_v62 = vsub.s32 %v423_v58, %v335_v8  ;;  %s314_s14 = scalar_lea.vmem %s804_s4, %s601_s8 }
  0x15   : > { %419 = vperm.xlu0 %651, %v403_v3   ;;  %v316_v9 = vld [vmem:[%s300_s11] sm:$0xf] }
  0x16   : > { %vm318_vm0 = vcmp.ge.f32.partialorder %v316_v9, 0.0 }
  0x8c   : > { %v326_v10 = vpop.permute.xlu0 %325 }
  0x8d   : > { %v328_v12 = vmul.f32 %v326_v10, %v316_v9  ;;  %v433_v0 = vpop.permute.xlu1 %432 }
  0x8e   : > { %v440_v4 = vrot.slane %v433_v0, %v426_v62 }
  0x8f   : > { %v329_v13 = vsel %vm318_vm0, %v316_v9, %v328_v12 }
  0x90   : > { %v337_v14 = vrot.slane %v329_v13, %v336_v11  ;;  %v420_v63 = vpop.permute.xlu0 %419 }
  0x91   : > { %v427_v3 = vrot.slane %v420_v63, %v426_v62 }
  0x92   : > { %v338_v15 = vcombine.high %v337_v14, %v337_v14  ;;  %v342_v16 = vsel %vm341_vm1, %v337_v14, 0.0 }
  0x93   : > { %v343_v17 = vrot.slane %v342_v16, 4 }
  0x94   : > { %v349_v18 = vsel %vm341_vm1, %v338_v15, 0.0 }
  0x95   : > { %v344_v19 = vadd.f32 %v343_v17, %v342_v16  ;;  %v350_v20 = vrot.slane %v349_v18, 4 }
  0x97   : > { %v345_v21 = vrot.slane %v344_v19, 2  ;;  %v351_v22 = vadd.f32 %v350_v20, %v349_v18 }
  0x99   : > { %v346_v23 = vadd.f32 %v345_v21, %v344_v19  ;;  %v352_v24 = vrot.slane %v351_v22, 2 }
  0x9b   : > { %v347_v25 = vrot.slane %v346_v23, 1  ;;  %v353_v26 = vadd.f32 %v352_v24, %v351_v22 }
  0x9d   : > { %v348_v27 = vadd.f32 %v347_v25, %v346_v23  ;;  %v354_v28 = vrot.slane %v353_v26, 1 }
  0x9f   : > { %v355_v29 = vadd.f32 %v354_v28, %v353_v26  ;;  %v357_v30 = vmul.f32 0.5, %v348_v27 }
  0xa1   : > { %v358_v31 = vmul.f32 0.5, %v355_v29 }
  0xa3   : > { %v361_v32 = vcombine.low %v357_v30, %v358_v31 }
  0xa5   : > { %v368_v33 = vrot.slane %v361_v32, %v336_v11 }
  0xa7   : > { %v370_v34 = vsub.f32 %v329_v13, %v368_v33 }
  0xa9   : > { %v371_v35 = vmul.f32 %v370_v34, %v370_v34 }
  0xab   : > { %v379_v36 = vrot.slane %v371_v35, %v336_v11 }
  0xad   : > { %v380_v37 = vcombine.high %v379_v36, %v379_v36  ;;  %v383_v38 = vsel %vm341_vm1, %v379_v36, 0.0 }
  0xae   : > { %v384_v39 = vrot.slane %v383_v38, 4 }
  0xaf   : > { %v390_v40 = vsel %vm341_vm1, %v380_v37, 0.0 }
  0xb0   : > { %v385_v41 = vadd.f32 %v384_v39, %v383_v38  ;;  %v391_v42 = vrot.slane %v390_v40, 4 }
  0xb2   : > { %v386_v43 = vrot.slane %v385_v41, 2  ;;  %v392_v44 = vadd.f32 %v391_v42, %v390_v40 }
  0xb4   : > { %v387_v45 = vadd.f32 %v386_v43, %v385_v41  ;;  %v393_v46 = vrot.slane %v392_v44, 2 }
  0xb6   : > { %v388_v47 = vrot.slane %v387_v45, 1  ;;  %v394_v48 = vadd.f32 %v393_v46, %v392_v44 }
  0xb8   : > { %v389_v49 = vadd.f32 %v388_v47, %v387_v45  ;;  %v395_v50 = vrot.slane %v394_v48, 1 }
  0xba   : > { %v396_v51 = vadd.f32 %v395_v50, %v394_v48  ;;  %v397_v52 = vmul.f32 0.5, %v389_v49 }
  0xbc   : > { %v398_v53 = vmul.f32 0.5, %v396_v51  ;;  %v399_v54 = vadd.f32 1e-05, %v397_v52 }
  0xbe   : > { %v400_v55 = vadd.f32 1e-05, %v398_v53  ;;  %653 = vrsqrt.f32 %v399_v54 }
  0xc0   : > { %655 = vrsqrt.f32 %v400_v55 }
  0xcb   : > { %v654_v59 = vpop.eup %653 }
  0xcd   : > { %v656_v60 = vpop.eup %655 }
  0xce   : > { %v407_v61 = vcombine.low %v654_v59, %v656_v60 }
  0xd0   : > { %v414_v1 = vrot.slane %v407_v61, %v336_v11 }
  0xd2   : > { %v416_v2 = vmul.f32 %v414_v1, %v370_v34 }
  0xd4   : > { %v429_v5 = vmul.f32 %v427_v3, %v416_v2 }
  0xd6   : > { %v442_v6 = vadd.f32 %v440_v4, %v429_v5 }
  0xd8   : > { %443 = vst [vmem:[%s314_s14] sm:$0xf] %v442_v6 }
  0xd9 PF: > { %s14_s19 = sadd.s32 1, %s695_s19   ;;  %s805_s15 = smov %s687_s17 }
  0xda   : > { %p11_p7 = scmp.ge.s32.totalorder %s14_s19, 10   ;;  %s806_s16 = smov %s691_s18 }
  0xdb   : > { %s807_s17 = smov %s810_s20  ;;  %s808_s18 = smov %s814_s21 }
  0xdc   :  { %13 = sbr.rel (!%p11_p7) target bundleno = 3 (0x3), region = 75 }

// kernel: gridnetv3_block_forward.12
= control target key start
LH: loop header
LB: loop body
LE: loop exit
PB: predicated region body
PF: predicated region fallthrough
CT: control target
= control target key end

     0   :  { %s609_s12 = smov 0   ;;  %s645_s0 = inlined_call_operand.vmem [shape: f32[8,16,64], index: 0, kind: input, shape index: {}]   ;;  %s646_s1 = inlined_call_operand.vmem [shape: f32[8,64,16], index: 1, kind: input, shape index: {}]   ;;  %s647_s2 = inlined_call_operand.vmem [shape: f32[8,16,32], index: 2, kind: input, shape index: {}]   ;;  %s648_s3 = inlined_call_operand.vmem [shape: f32[8,16,32], index: 3, kind: output, shape index: {}]  }
   0x1 LB: > { %s502_s13 = sadd.s32 4294967295, %s587_s12   ;;  %p506_p0 = scmp.ge.s32.totalorder %s587_s12, 1  ;;  %s587_s12 = sphi %s609_s12, %s13_s12  }
   0x2   : > { %p157_p1 = scmp.lt.s32.totalorder %s587_s12, 9 }
   0x4   : > { %p158_p2 = pnand %p506_p0, %p157_p1 }
   0x5   : > { %p191_p3 = scmp.lt.s32.totalorder (!%p158_p2), %s502_s13, 7 }
   0x6   : > { %161 = sbr.rel (%p158_p2) target bundleno = 741 (0x2e5), region = 32 }
   0xb   : > { %s650_s13 = smov (!%p191_p3, %s502_s13), 7  ;;  %vm223_vm0 = vcmask 523264   ;;  %v307_v10 = vlaneseq  ;;  %vm316_vm3 = vcmask 130048   ;;  %vm420_vm4 = vcmask 261120  }
   0xc   : > { %s522_s14 = sshll.u32 %s650_s13, 6  ;;  %s617_s15 = sshll.u32 %s650_s13, 4 }
   0xd   : > { %s200_s18 = scalar_lea.vmem %s646_s1, %s522_s14  ;;  %s195_s21 = scalar_lea.vmem %s645_s0, %s617_s15  ;;  %v308_v11 = vshrl.u32 %v307_v10, 7  ;;  %v311_v13 = vand.u32 127, %v307_v10 }
   0xe   : > { %v220_v0 = vld [vmem:[%s200_s18 + $0x38] sm:$0xff]  ;;  %v219_v1 = vld [vmem:[%s200_s18 + $0x30] sm:$0xff]  ;;  %v218_v2 = vld [vmem:[%s200_s18 + $0x28] sm:$0xff]  ;;  %s205_s24 = scalar_lea.vmem %s647_s2, %s617_s15  ;;  %s210_s27 = scalar_lea.vmem %s648_s3, %s617_s15 }
   0xf   : > { %539 = vmatprep.subr.mxu0 %v220_v0  ;;  %v211_v3 = vld [vmem:[%s195_s21] sm:$0xff]  ;;  %v216_v5 = vld [vmem:[%s200_s18 + $0x18] sm:$0xff]  ;;  %v215_v6 = vld [vmem:[%s200_s18 + $0x10] sm:$0xff]  ;;  %v309_v14 = vadd.s32 8, %v308_v11  ;;  %vm312_vm1 = vcmp.le.s32.totalorder %v311_v13, %v308_v11 }
  0x10   : > { %540 = vmatpush3.msra.mxu0 %v220_v0  ;;  %555 = vmatprep.mubr.msk.f32.mxu0 %vm223_vm0, %v211_v3  ;;  %v217_v4 = vld [vmem:[%s200_s18 + $0x20] sm:$0xff]  ;;  %v214_v7 = vld [vmem:[%s200_s18 + $0x8] sm:$0xff] }
  0x11   : > { %541 = vmatprep.subr.mxu0 %v219_v1  ;;  %v213_v8 = vld [vmem:[%s200_s18] sm:$0xff]  ;;  %v212_v9 = vld [vmem:[%s195_s21 + $0x8] sm:$0xff]  ;;  %vm313_vm2 = vcmp.le.s32.totalorder %v311_v13, %v309_v14 }
  0x12   : > { %542 = vmatpush3.msra.mxu0 %v219_v1  ;;  %v222_v32 = vld [vmem:[%s205_s24 + $0x8] sm:$0xff]  ;;  %v221_v33 = vld [vmem:[%s205_s24] sm:$0xff] }
  0x13   : > { %543 = vmatprep.subr.mxu0 %v218_v2  ;;  %558 = vmatprep.subr.mxu1 %v222_v32 }
  0x14   : > { %544 = vmatpush3.msra.mxu0 %v218_v2  ;;  %559 = vmatpush3.msra.mxu1 %v222_v32 }
  0x15   : > { %545 = vmatprep.subr.mxu0 %v217_v4  ;;  %560 = vmatprep.subr.mxu1 %v221_v33 }
  0x16   : > { %546 = vmatpush3.msra.mxu0 %v217_v4  ;;  %561 = vmatpush3.msra.mxu1 %v221_v33 }
  0x17   : > { %547 = vmatprep.subr.mxu0 %v216_v5 }
  0x18   : > { %548 = vmatpush3.msra.mxu0 %v216_v5 }
  0x19   : > { %549 = vmatprep.subr.mxu0 %v215_v6 }
  0x1a   : > { %550 = vmatpush3.msra.mxu0 %v215_v6 }
  0x1b   : > { %551 = vmatprep.subr.mxu0 %v214_v7 }
  0x1c   : > { %552 = vmatpush3.msra.mxu0 %v214_v7 }
  0x1d   : > { %553 = vmatprep.subr.mxu0 %v213_v8 }
  0x1e   : > { %554 = vmatpush3.msra.mxu0 %v213_v8 }
  0x1f   : > { %556 = vmatmul.mubr.msk.f32.vlgmr.msra.gmra.mxu0 %vm223_vm0, %v212_v9 }
  0xdf   : > { %v557_v12 = vpop.f32.mrf.mxu0 }
  0xe0   : > { %v306_v16 = vmul.f32 0.125, %v557_v12 }
  0xe1   : > { %v296_v15 = vpop.f32.mrf.mxu0 }
  0xe2   : > { %v305_v17 = vmul.f32 0.125, %v296_v15  ;;  %v315_v20 = vsel %vm313_vm2, %v306_v16, -1e+30 }
  0xe3   : > { %v320_v21 = vsel %vm316_vm3, %v315_v20, -inf }
  0xe4   : > { %v314_v18 = vsel %vm312_vm1, %v305_v17, -1e+30 }
  0xe5   : > { %v317_v19 = vsel %vm316_vm3, %v314_v18, -inf }
  0xe6   : > { %318 = vmax.xlane.f32.xlu0 %v317_v19 }
  0xea   : > { %321 = vmax.xlane.f32.xlu0 %v320_v21 }
 0x16f   : > { %v319_v22 = vpop.xlane.xlu0 %318 }
 0x170   : > { %v323_v23 = vsub.f32 %v314_v18, %v319_v22 }
 0x172   : > { %v325_v24 = vmul.f32 1.442695, %v323_v23 }
 0x173   : > { %v322_v25 = vpop.xlane.xlu0 %321 }
 0x174   : > { %573 = vpow2.f32 %v325_v24  ;;  %v324_v26 = vsub.f32 %v315_v20, %v322_v25 }
 0x176   : > { %v327_v27 = vmul.f32 1.442695, %v324_v26 }
 0x178   : > { %575 = vpow2.f32 %v327_v27 }
 0x181   : > { %v574_v28 = vpop.eup %573 }
 0x182   : > { %v329_v29 = vsel %vm316_vm3, %v574_v28, 0.0 }
 0x183   : > { %330 = vadd.xlane.f32.xlu1 %v329_v29 }
 0x185   : > { %v576_v30 = vpop.eup %575 }
 0x186   : > { %v332_v31 = vsel %vm316_vm3, %v576_v30, 0.0 }
 0x187   : > { %333 = vadd.xlane.f32.xlu1 %v332_v31 }
 0x20c   : > { %v331_v34 = vpop.xlane.xlu1 %330 }
 0x20d   : > { %577 = vrcp.f32 %v331_v34 }
 0x210   : > { %v334_v35 = vpop.xlane.xlu1 %333 }
 0x211   : > { %579 = vrcp.f32 %v334_v35 }
 0x21a   : > { %v578_v36 = vpop.eup %577 }
 0x21b   : > { %v336_v37 = vmul.f32 %v578_v36, %v574_v28 }
 0x21d   : > { %562 = vmatprep.mubr.msk.f32.mxu1 %vm316_vm3, %v336_v37 }
 0x21e   : > { %v580_v38 = vpop.eup %579 }
 0x21f   : > { %v338_v39 = vmul.f32 %v580_v38, %v576_v30 }
 0x221   : > { %563 = vmatmul.mubr.msk.f32.vlgmr.msra.gmra.mxu1 %vm316_vm3, %v338_v39 }
 0x2e1   : > { %v564_v40 = vpop.f32.mrf.mxu1 }
 0x2e2   : > { %422 = vst.msk [vmem:[%s210_s27 + $0x8] sm:$0xff] %vm420_vm4, %v564_v40 }
 0x2e3   : > { %v411_v41 = vpop.f32.mrf.mxu1 }
 0x2e4   : > { %421 = vst.msk [vmem:[%s210_s27] sm:$0xff] %vm420_vm4, %v411_v41 }
 0x2e5 PF: > { %s13_s12 = sadd.s32 1, %s587_s12  }
 0x2e6   : > { %p10_p4 = scmp.ge.s32.totalorder %s13_s12, 10  }
 0x2e8   :  { %12 = sbr.rel (!%p10_p4) target bundleno = 1 (0x1), region = 68 }

// kernel: gridnetv3_block_forward.13
= control target key start
LH: loop header
LB: loop body
LE: loop exit
PB: predicated region body
PF: predicated region fallthrough
CT: control target
= control target key end

     0   :  { %s648_s17 = smov 0   ;;  %s650_s18 = smov 0   ;;  %s694_s0 = inlined_call_operand.<no memory space> [shape: f32[1,1,1], index: 0, kind: input, shape index: {}]   ;;  %s695_s1 = inlined_call_operand.vmem [shape: f32[1,8,1], index: 1, kind: input, shape index: {}]   ;;  %s696_s2 = inlined_call_operand.vmem [shape: f32[1,8,1], index: 2, kind: input, shape index: {}]   ;;  %s697_s3 = inlined_call_operand.vmem [shape: f32[2,1,8,256], index: 3, kind: input, shape index: {}]   ;;  %s698_s4 = inlined_call_operand.vmem [shape: f32[2,1,8,256], index: 4, kind: output, shape index: {}]  }
   0x1   :  { %v9_v0 = vstv %s694_s0  ;;  %s652_s19 = smov 0  }
   0x2   :  { %10 = vst [vmem:[#allocation2] sm:$0x1] %v9_v0 }
   0x3 LB: > { %s35_s0 = sadd.s32 1, %s613_s18  ;;  %p554_p0 = scmp.ge.s32.totalorder %s617_s19, 1  ;;  %s617_s19 = sphi %s652_s19, %s16_s19   ;;  %s613_s18 = sphi %s650_s18, %s700_s18   ;;  %s609_s17 = sphi %s648_s17, %s699_s17  }
   0x4   : > { %p37_p1 = scmp.ge.s32.totalorder %s35_s0, 2  ;;  %p226_p2 = scmp.lt.s32.totalorder %s617_s19, 3 }
   0x6   : > { %s702_s0 = smov (%p37_p1, %s35_s0), 0  ;;  %p227_p3 = pnand %p554_p0, %p226_p2 }
   0x7   : > { %p291_p4 = scmp.lt.s32.totalorder (!%p227_p3), %s609_s17, 1 }
   0x8   : > { %230 = sbr.rel (%p227_p3) target bundleno = 198 (0xc6), region = 36 }
   0xd   : > { %v559_v1 = vld [vmem:[#allocation2] ss:$0 sm:$0xff]  ;;  %v619_v3 = vmov 0   ;;  %s704_s17 = smov (!%p291_p4, %s609_s17), 1 }
   0xe   : > { %v374_v2 = vld [vmem:[%s696_s2] sm:$0xff]  ;;  %589 = vset.pattern.permute.xlu0 %v619_v3  ;;  %590 = vset.pattern.permute.xlu1 %v619_v3  ;;  %s562_s24 = sshll.u32 %s704_s17, 4 }
   0xf   : > { %329 = vperm.xlu0 %589, %v559_v1   ;;  %386 = vperm.xlu1 %590, %v374_v2   ;;  %v373_v4 = vld [vmem:[%s695_s1] sm:$0xff]  ;;  %s302_s27 = scalar_lea.vmem %s697_s3, %s562_s24  ;;  %s316_s30 = scalar_lea.vmem %s698_s4, %s562_s24 }
  0x10   : > { %v318_v5 = vld [vmem:[%s302_s27] sm:$0xff]  ;;  %v319_v6 = vld [vmem:[%s302_s27 + $0x8] sm:$0xff] }
  0x11   : > { %vm321_vm0 = vcmp.ge.f32.partialorder %v318_v5, 0.0  ;;  %vm322_vm1 = vcmp.ge.f32.partialorder %v319_v6, 0.0 }
  0x13   : > { %379 = vperm.xlu0 %589, %v373_v4  }
  0x8a   : > { %v330_v7 = vpop.permute.xlu0 %329  ;;  %v387_v51 = vpop.permute.xlu1 %386 }
  0x8b   : > { %v332_v8 = vmul.f32 %v330_v7, %v318_v5  ;;  %v333_v9 = vmul.f32 %v330_v7, %v319_v6 }
  0x8d   : > { %v334_v10 = vsel %vm321_vm0, %v318_v5, %v332_v8  ;;  %v335_v11 = vsel %vm322_vm1, %v319_v6, %v333_v9 }
  0x8e   : > { %v336_v12 = vrot.slane %v334_v10, 4  ;;  %v342_v13 = vrot.slane %v335_v11, 4  ;;  %v380_v49 = vpop.permute.xlu0 %379 }
  0x90   : > { %v337_v14 = vadd.f32 %v336_v12, %v334_v10  ;;  %v343_v15 = vadd.f32 %v342_v13, %v335_v11 }
  0x92   : > { %v338_v16 = vrot.slane %v337_v14, 2  ;;  %v344_v17 = vrot.slane %v343_v15, 2 }
  0x94   : > { %v339_v18 = vadd.f32 %v338_v16, %v337_v14  ;;  %v345_v19 = vadd.f32 %v344_v17, %v343_v15 }
  0x96   : > { %v340_v20 = vrot.slane %v339_v18, 1  ;;  %v346_v21 = vrot.slane %v345_v19, 1 }
  0x98   : > { %v341_v22 = vadd.f32 %v340_v20, %v339_v18  ;;  %v347_v23 = vadd.f32 %v346_v21, %v345_v19 }
  0x9a   : > { %v349_v24 = vmul.f32 0.125, %v341_v22  ;;  %v350_v25 = vmul.f32 0.125, %v347_v23 }
  0x9c   : > { %v351_v26 = vsub.f32 %v334_v10, %v349_v24  ;;  %v352_v27 = vsub.f32 %v335_v11, %v350_v25 }
  0x9e   : > { %v353_v28 = vmul.f32 %v351_v26, %v351_v26  ;;  %v354_v29 = vmul.f32 %v352_v27, %v352_v27 }
  0xa0   : > { %v355_v30 = vrot.slane %v353_v28, 4  ;;  %v361_v31 = vrot.slane %v354_v29, 4 }
  0xa2   : > { %v356_v32 = vadd.f32 %v355_v30, %v353_v28  ;;  %v362_v33 = vadd.f32 %v361_v31, %v354_v29 }
  0xa4   : > { %v357_v34 = vrot.slane %v356_v32, 2  ;;  %v363_v35 = vrot.slane %v362_v33, 2 }
  0xa6   : > { %v358_v36 = vadd.f32 %v357_v34, %v356_v32  ;;  %v364_v37 = vadd.f32 %v363_v35, %v362_v33 }
  0xa8   : > { %v359_v38 = vrot.slane %v358_v36, 1  ;;  %v365_v39 = vrot.slane %v364_v37, 1 }
  0xaa   : > { %v360_v40 = vadd.f32 %v359_v38, %v358_v36  ;;  %v366_v41 = vadd.f32 %v365_v39, %v364_v37 }
  0xac   : > { %v367_v42 = vmul.f32 0.125, %v360_v40  ;;  %v368_v43 = vmul.f32 0.125, %v366_v41 }
  0xae   : > { %v369_v44 = vadd.f32 1e-05, %v367_v42  ;;  %v370_v45 = vadd.f32 1e-05, %v368_v43 }
  0xb0   : > { %591 = vrsqrt.f32 %v369_v44 }
  0xb1   : > { %593 = vrsqrt.f32 %v370_v45 }
  0xbd   : > { %v592_v46 = vpop.eup %591 }
  0xbe   : > { %v594_v47 = vpop.eup %593  ;;  %v375_v48 = vmul.f32 %v592_v46, %v351_v26 }
  0xbf   : > { %v376_v50 = vmul.f32 %v594_v47, %v352_v27 }
  0xc0   : > { %v382_v52 = vmul.f32 %v380_v49, %v375_v48 }
  0xc1   : > { %v383_v53 = vmul.f32 %v380_v49, %v376_v50 }
  0xc2   : > { %v389_v54 = vadd.f32 %v387_v51, %v382_v52 }
  0xc3   : > { %v390_v55 = vadd.f32 %v387_v51, %v383_v53 }
  0xc4   : > { %391 = vst [vmem:[%s316_s30] sm:$0xff] %v389_v54 }
  0xc5   : > { %392 = vst [vmem:[%s316_s30 + $0x8] sm:$0xff] %v390_v55 }
  0xc6 PF: > { %s16_s19 = sadd.s32 1, %s617_s19   ;;  %s699_s17 = smov %s613_s18 }
  0xc7   : > { %p13_p5 = scmp.ge.s32.totalorder %s16_s19, 4   ;;  %s700_s18 = smov %s702_s0 }
  0xc9   :  { %15 = sbr.rel (!%p13_p5) target bundleno = 3 (0x3), region = 75 }

</bundles_post_ra>
